<compile_context>
chip_gen: v7x
topology: tpu7x:2x2x1
jax: 0.10.0
libtpu: 0.0.40
codegen_flags: <defaults>
</compile_context>

<pallas_src>
import functools

import jax
import jax.numpy as jnp
from jax.experimental import pallas as pl
from jax.experimental.pallas import tpu as pltpu


# ----------------------------------------------------------------------------
# Kernel
# ----------------------------------------------------------------------------
def _roi_head_kernel(
    x_ref,    # (TN, TK)   f32   pooled-feature tile (rows x K-slice)
    w6_ref,   # (TK, H)    bf16  fc6 weight K-slice (transposed, pre-packed)
    b6_ref,   # (1, H)     f32
    w7_ref,   # (H, H)     bf16  fc7 weight (transposed, pre-packed)
    b7_ref,   # (1, H)     f32
    wp_ref,   # (H, CP)    bf16  fused [cls_score | bbox_pred] weight, lane-padded
    bp_ref,   # (1, CP)    f32   fused bias, lane-padded
    out_ref,  # (TN, CP)   f32   fused lane-dense output
    acc_ref,  # (TN, H)    f32   fc6 accumulator scratch
):
    k = pl.program_id(1)

    @pl.when(k == 0)
    def _():
        acc_ref[...] = jnp.zeros_like(acc_ref)

    # fc6 partial product over the feature (K) axis.  x arrives in f32 and is
    # cast to bf16 per tile (VPU work hidden under the MXU); accumulate in f32.
    acc_ref[...] += jnp.dot(
        x_ref[...].astype(jnp.bfloat16), w6_ref[...],
        preferred_element_type=jnp.float32,
    )

    @pl.when(k == pl.num_programs(1) - 1)
    def _():
        # fc6 bias + ReLU (f32).
        h = jnp.maximum(acc_ref[...] + b6_ref[...], 0.0)
        # fc7 -> ReLU (bf16 operands, f32 accumulate).
        h = jnp.dot(h.astype(jnp.bfloat16), w7_ref[...],
                    preferred_element_type=jnp.float32)
        h = jnp.maximum(h + b7_ref[...], 0.0)
        # Fused FastRCNNPredictor: one matmul, one lane-dense (>=128 lane)
        # unmasked store; cls/box are sliced apart in the wrapper.
        y = jnp.dot(h.astype(jnp.bfloat16), wp_ref[...],
                    preferred_element_type=jnp.float32)
        out_ref[...] = (y + bp_ref[...]).astype(out_ref.dtype)


# ----------------------------------------------------------------------------
# One-time weight packing (hoisted out of the per-call hot path)
# ----------------------------------------------------------------------------
def _pad_axis_to(a, mult, axis):
    pad = (-a.shape[axis]) % mult
    if pad == 0:
        return a
    widths = [(0, 0)] * a.ndim
    widths[axis] = (0, pad)
    return jnp.pad(a, widths)


def _choose_tile_k(f, max_tile=2048):
    """Largest multiple of 128 that divides f (<= max_tile) so no K padding is
    needed.  Real RoI head: F = 256*7*7 = 12544 -> 1792.  Falls back to 512
    (with K padding) if F has no 128-multiple divisor."""
    best = 0
    k = 128
    while k <= min(f, max_tile):
        if f % k == 0:
            best = k
        k += 128
    return best if best else min(512, max_tile)


def pack_roi_head_params(w6, b6, w7, b7, wc, bc, wb, bb, *, tile_k=None):
    """Pre-pack the RoI head weights ONCE (not per inference call).

    Weights are expected transposed, i.e. shaped (in, out).  Casts weights to
    bf16 (MXU-native, halves weight DMA bytes), pads fc6's K axis to a
    multiple of tile_k, and fuses cls_score | bbox_pred into one lane-padded
    (>=128-wide) weight/bias so the kernel does a single lane-dense store.
    """
    f, h = w6.shape
    c = wc.shape[1]
    c4 = wb.shape[1]
    if tile_k is None:
        tile_k = _choose_tile_k(f)
    c_pad = max(128, ((c + c4 + 127) // 128) * 128)

    w6_bf = _pad_axis_to(jnp.asarray(w6, jnp.float32), tile_k, 0).astype(jnp.bfloat16)
    w7_bf = jnp.asarray(w7).astype(jnp.bfloat16)
    wp = (jnp.zeros((h, c_pad), jnp.float32)
          .at[:, :c].set(jnp.asarray(wc, jnp.float32))
          .at[:, c:c + c4].set(jnp.asarray(wb, jnp.float32)))
    bp = (jnp.zeros((1, c_pad), jnp.float32)
          .at[:, :c].set(jnp.reshape(jnp.asarray(bc, jnp.float32), (1, c)))
          .at[:, c:c + c4].set(jnp.reshape(jnp.asarray(bb, jnp.float32), (1, c4))))
    wp_bf = wp.astype(jnp.bfloat16)
    b6_f = jnp.reshape(jnp.asarray(b6, jnp.float32), (1, h))
    b7_f = jnp.reshape(jnp.asarray(b7, jnp.float32), (1, h))

    packed = (w6_bf, b6_f, w7_bf, b7_f, wp_bf, bp)
    meta = dict(tile_k=int(tile_k), c=int(c), c4=int(c4), c_pad=int(c_pad))
    return packed, meta


# ----------------------------------------------------------------------------
# Hot-path call
# ----------------------------------------------------------------------------
@functools.partial(jax.jit, static_argnames=("tile_k", "num_row_tiles", "max_tile_n"))
def _roi_head_call(x, w6_bf, b6_f, w7_bf, b7_f, wp_bf, bp_f, *,
                   tile_k, num_row_tiles, max_tile_n):
    n, f = x.shape
    f_pad, h = w6_bf.shape
    c_pad = wp_bf.shape[1]

    # Row tile: as few row tiles as possible so w6 is streamed only
    # num_row_tiles times total; capped so the f32 x tile + f32 accumulator
    # stay comfortably inside VMEM on every generation.
    tile_n = -(-n // num_row_tiles)                 # ceil
    tile_n = max(8, min(tile_n, max_tile_n))
    tile_n = -(-tile_n // 8) * 8                    # sublane multiple
    num_tiles = -(-n // tile_n)
    n_pad = tile_n * num_tiles

    x_p = x
    if n_pad != n or f_pad != f:
        x_p = jnp.pad(x, ((0, n_pad - n), (0, f_pad - f)))

    grid = (num_tiles, f_pad // tile_k)

    # Right-size the scoped VMEM limit from the double-buffered working set.
    est = (2 * tile_n * tile_k * 4        # x tile (f32, double buffered)
           + 2 * tile_k * h * 2           # w6 K-slice (bf16)
           + 2 * h * h * 2                # w7 (bf16)
           + 2 * h * c_pad * 2            # fused predictor weight (bf16)
           + 2 * (2 * h + c_pad) * 4      # biases (f32)
           + 2 * tile_n * c_pad * 4       # output tile (f32)
           + tile_n * h * 4)              # accumulator scratch (f32)
    vmem_limit = min(max(int(est * 1.25) + (2 << 20), 8 << 20), 64 << 20)

    grid_spec = pltpu.PrefetchScalarGridSpec(
        num_scalar_prefetch=0,
        grid=grid,
        in_specs=[
            pl.BlockSpec((tile_n, tile_k), lambda i, k: (i, k)),   # x
            pl.BlockSpec((tile_k, h), lambda i, k: (k, 0)),        # w6 slice
            pl.BlockSpec((1, h), lambda i, k: (0, 0)),             # b6
            pl.BlockSpec((h, h), lambda i, k: (0, 0)),             # w7
            pl.BlockSpec((1, h), lambda i, k: (0, 0)),             # b7
            pl.BlockSpec((h, c_pad), lambda i, k: (0, 0)),         # fused W
            pl.BlockSpec((1, c_pad), lambda i, k: (0, 0)),         # fused b
        ],
        out_specs=pl.BlockSpec((tile_n, c_pad), lambda i, k: (i, 0)),
        scratch_shapes=[pltpu.VMEM((tile_n, h), jnp.float32)],
    )

    return pl.pallas_call(
        _roi_head_kernel,
        out_shape=jax.ShapeDtypeStruct((n_pad, c_pad), jnp.float32),
        grid_spec=grid_spec,
        compiler_params=pltpu.CompilerParams(
            dimension_semantics=("parallel", "arbitrary"),
            vmem_limit_bytes=vmem_limit,
        ),
    )(x_p, w6_bf, b6_f, w7_bf, b7_f, wp_bf, bp_f)


def roi_box_head_predictor(x, packed_params, meta, *,
                           num_row_tiles=1, max_tile_n=1024):
    """Fused TwoMLPHead + FastRCNNPredictor on pooled RoI features.

    x : (N, F) float pooled features (N = #RoIs, F = C*7*7 flattened).
    packed_params, meta : output of `pack_roi_head_params` (one-time packing).
    num_row_tiles : 1 on v5e/v6e (w6 streamed once); 2 on v7x so both
                    TensorCores get a row tile on the "parallel" axis.
    Returns (class_logits (N, C), box_regression (N, 4C)) in f32.
    """
    c, c4 = meta["c"], meta["c4"]
    n = x.shape[0]
    if n == 0:
        # Post-NMS proposal count can be zero; skip the kernel entirely.
        return (jnp.zeros((0, c), jnp.float32),
                jnp.zeros((0, c4), jnp.float32))
    out = _roi_head_call(x, *packed_params,
                         tile_k=meta["tile_k"],
                         num_row_tiles=num_row_tiles,
                         max_tile_n=max_tile_n)
    return out[:n, :c], out[:n, c:c + c4]


# ----------------------------------------------------------------------------
# Reference + test
# ----------------------------------------------------------------------------
def _reference(x, w6, b6, w7, b7, wc, bc, wb, bb):
    h = jnp.maximum(x @ w6 + b6, 0.0)
    h = jnp.maximum(h @ w7 + b7, 0.0)
    return h @ wc + bc, h @ wb + bb


if __name__ == "__main__":
    # Small TPU-friendly stand-ins for the real RoI head shapes
    # (real model: F = 256*7*7 = 12544, H = 1024, N ~ 1000 proposals, C = 2).
    # N deliberately NOT a multiple of the row tile to exercise padding.
    N, F, H, C = 200, 512, 256, 2

    key = jax.random.PRNGKey(0)
    ks = jax.random.split(key, 9)
    scale = 0.05
    x  = jax.random.normal(ks[0], (N, F), jnp.float32)
    w6 = scale * jax.random.normal(ks[1], (F, H), jnp.float32)
    b6 = scale * jax.random.normal(ks[2], (1, H), jnp.float32)
    w7 = scale * jax.random.normal(ks[3], (H, H), jnp.float32)
    b7 = scale * jax.random.normal(ks[4], (1, H), jnp.float32)
    wc = scale * jax.random.normal(ks[5], (H, C), jnp.float32)
    bc = scale * jax.random.normal(ks[6], (1, C), jnp.float32)
    wb = scale * jax.random.normal(ks[7], (H, 4 * C), jnp.float32)
    bb = scale * jax.random.normal(ks[8], (1, 4 * C), jnp.float32)

    # One-time packing (would be done at model-load time, not per inference).
    packed, meta = pack_roi_head_params(w6, b6, w7, b7, wc, bc, wb, bb)
    jax.block_until_ready(packed)

    cls_logits, box_deltas = roi_box_head_predictor(x, packed, meta)
    jax.block_until_ready((cls_logits, box_deltas))

    ref_cls, ref_box = _reference(x, w6, b6, w7, b7, wc, bc, wb, bb)
    assert cls_logits.shape == (N, C) and box_deltas.shape == (N, 4 * C)
    # bf16 operands with f32 accumulation -> loosened tolerance vs f32 ref.
    assert jnp.allclose(cls_logits, ref_cls, atol=3e-2, rtol=3e-2), (
        float(jnp.max(jnp.abs(cls_logits - ref_cls)))
    )
    assert jnp.allclose(box_deltas, ref_box, atol=3e-2, rtol=3e-2), (
        float(jnp.max(jnp.abs(box_deltas - ref_box)))
    )

    # Two-row-tile (v7x-style) path must agree as well.
    cls2, box2 = roi_box_head_predictor(x, packed, meta, num_row_tiles=2)
    jax.block_until_ready((cls2, box2))
    assert jnp.allclose(cls2, ref_cls, atol=3e-2, rtol=3e-2)
    assert jnp.allclose(box2, ref_box, atol=3e-2, rtol=3e-2)

    # N = 0 edge case (no post-NMS proposals) must not hit the kernel.
    cls0, box0 = roi_box_head_predictor(jnp.zeros((0, F), jnp.float32), packed, meta)
    assert cls0.shape == (0, C) and box0.shape == (0, 4 * C)

    print("KERNEL_OK")
</pallas_src>

<mosaic_0001>
module attributes {stable_mosaic.version = 11 : i64} {
  func.func @_roi_head_kernel(%arg0: i32, %arg1: i32, %arg2: memref<200x512xf32, #tpu.memory_space<vmem>>, %arg3: memref<512x256xbf16, #tpu.memory_space<vmem>>, %arg4: memref<1x256xf32, #tpu.memory_space<vmem>>, %arg5: memref<256x256xbf16, #tpu.memory_space<vmem>>, %arg6: memref<1x256xf32, #tpu.memory_space<vmem>>, %arg7: memref<256x128xbf16, #tpu.memory_space<vmem>>, %arg8: memref<1x128xf32, #tpu.memory_space<vmem>>, %arg9: memref<200x128xf32, #tpu.memory_space<vmem>>, %arg10: memref<200x256xf32, #tpu.memory_space<vmem>>) attributes {dimension_semantics = [#tpu.dimension_semantics<parallel>, #tpu.dimension_semantics<arbitrary>], iteration_bounds = array<i64: 1, 1>, scalar_prefetch = 0 : i64, scratch_operands = 1 : i64, tpu.core_type = #tpu.core_type<tc>, window_params = [{transform_indices = @transform_0, window_bounds = array<i64: 200, 512>}, {transform_indices = @transform_1, window_bounds = array<i64: 512, 256>}, {pipeline_mode = #tpu.pipeline_mode<synchronous>, transform_indices = @transform_2, window_bounds = array<i64: 1, 256>}, {pipeline_mode = #tpu.pipeline_mode<synchronous>, transform_indices = @transform_3, window_bounds = array<i64: 256, 256>}, {pipeline_mode = #tpu.pipeline_mode<synchronous>, transform_indices = @transform_4, window_bounds = array<i64: 1, 256>}, {pipeline_mode = #tpu.pipeline_mode<synchronous>, transform_indices = @transform_5, window_bounds = array<i64: 256, 128>}, {pipeline_mode = #tpu.pipeline_mode<synchronous>, transform_indices = @transform_6, window_bounds = array<i64: 1, 128>}, {transform_indices = @transform_7, window_bounds = array<i64: 200, 128>}]} {
    %c0_i32 = arith.constant 0 : i32
    %0 = arith.cmpi eq, %arg1, %c0_i32 : i32
    %1 = arith.extui %0 : i1 to i32
    %c0_i32_0 = arith.constant 0 : i32
    %2 = arith.cmpi ne, %1, %c0_i32_0 : i32
    scf.if %2 {
      %cst_10 = arith.constant 0.000000e+00 : f32
      %13 = vector.broadcast %cst_10 : f32 to vector<200x256xf32>
      %c0_11 = arith.constant 0 : index
      %c0_12 = arith.constant 0 : index
      %14 = vector.load %arg10[%c0_11, %c0_12] : memref<200x256xf32, #tpu.memory_space<vmem>>, vector<200x256xf32>
      tpu.vector_store %arg10[%c0_11, %c0_12], %13 {strides = array<i32>} : memref<200x256xf32, #tpu.memory_space<vmem>>, vector<200x256xf32>,
    } else {
    }
    %c0 = arith.constant 0 : index
    %c0_1 = arith.constant 0 : index
    %3 = vector.load %arg10[%c0, %c0_1] : memref<200x256xf32, #tpu.memory_space<vmem>>, vector<200x256xf32>
    %c0_2 = arith.constant 0 : index
    %c0_3 = arith.constant 0 : index
    %4 = vector.load %arg2[%c0_2, %c0_3] : memref<200x512xf32, #tpu.memory_space<vmem>>, vector<200x512xf32>
    %5 = arith.truncf %4 : vector<200x512xf32> to vector<200x512xbf16>
    %c0_4 = arith.constant 0 : index
    %c0_5 = arith.constant 0 : index
    %6 = vector.load %arg3[%c0_4, %c0_5] : memref<512x256xbf16, #tpu.memory_space<vmem>>, vector<512x256xbf16>
    %cst = arith.constant dense<0.000000e+00> : vector<200x256xf32>
    %7 = tpu.matmul %5, %6, %cst {dimension_numbers = #tpu.dot_dimension_numbers<[1], [0], [0], [1], [0, 0, 1, 1], [], []>} : vector<200x512xbf16>, vector<512x256xbf16>, vector<200x256xf32> -> vector<200x256xf32>
    %8 = arith.addf %3, %7 : vector<200x256xf32>
    %c0_6 = arith.constant 0 : index
    %c0_7 = arith.constant 0 : index
    %9 = vector.load %arg10[%c0_6, %c0_7] : memref<200x256xf32, #tpu.memory_space<vmem>>, vector<200x256xf32>
    tpu.vector_store %arg10[%c0_6, %c0_7], %8 {strides = array<i32>} : memref<200x256xf32, #tpu.memory_space<vmem>>, vector<200x256xf32>,
    %c0_i32_8 = arith.constant 0 : i32
    %10 = arith.cmpi eq, %arg1, %c0_i32_8 : i32
    %11 = arith.extui %10 : i1 to i32
    %c0_i32_9 = arith.constant 0 : i32
    %12 = arith.cmpi ne, %11, %c0_i32_9 : i32
    scf.if %12 {
      %c0_10 = arith.constant 0 : index
      %c0_11 = arith.constant 0 : index
      %13 = vector.load %arg10[%c0_10, %c0_11] : memref<200x256xf32, #tpu.memory_space<vmem>>, vector<200x256xf32>
      %c0_12 = arith.constant 0 : index
      %c0_13 = arith.constant 0 : index
      %14 = vector.load %arg4[%c0_12, %c0_13] : memref<1x256xf32, #tpu.memory_space<vmem>>, vector<1x256xf32>
      %15 = vector.broadcast %14 : vector<1x256xf32> to vector<200x256xf32>
      %16 = arith.addf %13, %15 : vector<200x256xf32>
      %cst_14 = arith.constant 0.000000e+00 : f32
      %17 = vector.broadcast %cst_14 : f32 to vector<200x256xf32>
      %18 = arith.maximumf %16, %17 : vector<200x256xf32>
      %19 = arith.truncf %18 : vector<200x256xf32> to vector<200x256xbf16>
      %c0_15 = arith.constant 0 : index
      %c0_16 = arith.constant 0 : index
      %20 = vector.load %arg5[%c0_15, %c0_16] : memref<256x256xbf16, #tpu.memory_space<vmem>>, vector<256x256xbf16>
      %cst_17 = arith.constant dense<0.000000e+00> : vector<200x256xf32>
      %21 = tpu.matmul %19, %20, %cst_17 {dimension_numbers = #tpu.dot_dimension_numbers<[1], [0], [0], [1], [0, 0, 1, 1], [], []>} : vector<200x256xbf16>, vector<256x256xbf16>, vector<200x256xf32> -> vector<200x256xf32>
      %c0_18 = arith.constant 0 : index
      %c0_19 = arith.constant 0 : index
      %22 = vector.load %arg6[%c0_18, %c0_19] : memref<1x256xf32, #tpu.memory_space<vmem>>, vector<1x256xf32>
      %23 = vector.broadcast %22 : vector<1x256xf32> to vector<200x256xf32>
      %24 = arith.addf %21, %23 : vector<200x256xf32>
      %cst_20 = arith.constant 0.000000e+00 : f32
      %25 = vector.broadcast %cst_20 : f32 to vector<200x256xf32>
      %26 = arith.maximumf %24, %25 : vector<200x256xf32>
      %27 = arith.truncf %26 : vector<200x256xf32> to vector<200x256xbf16>
      %c0_21 = arith.constant 0 : index
      %c0_22 = arith.constant 0 : index
      %28 = vector.load %arg7[%c0_21, %c0_22] : memref<256x128xbf16, #tpu.memory_space<vmem>>, vector<256x128xbf16>
      %cst_23 = arith.constant dense<0.000000e+00> : vector<200x128xf32>
      %29 = tpu.matmul %27, %28, %cst_23 {dimension_numbers = #tpu.dot_dimension_numbers<[1], [0], [0], [1], [0, 0, 1, 1], [], []>} : vector<200x256xbf16>, vector<256x128xbf16>, vector<200x128xf32> -> vector<200x128xf32>
      %c0_24 = arith.constant 0 : index
      %c0_25 = arith.constant 0 : index
      %30 = vector.load %arg8[%c0_24, %c0_25] : memref<1x128xf32, #tpu.memory_space<vmem>>, vector<1x128xf32>
      %31 = vector.broadcast %30 : vector<1x128xf32> to vector<200x128xf32>
      %32 = arith.addf %29, %31 : vector<200x128xf32>
      %c0_26 = arith.constant 0 : index
      %c0_27 = arith.constant 0 : index
      %33 = vector.load %arg9[%c0_26, %c0_27] : memref<200x128xf32, #tpu.memory_space<vmem>>, vector<200x128xf32>
      tpu.vector_store %arg9[%c0_26, %c0_27], %32 {strides = array<i32>} : memref<200x128xf32, #tpu.memory_space<vmem>>, vector<200x128xf32>,
    } else {
    }
    return
  }
  func.func @transform_0(%arg0: i32, %arg1: i32) -> (i32, i32) {
    %c0_i32 = arith.constant 0 : i32
    return %arg0, %arg1 : i32, i32
  }
  func.func @transform_1(%arg0: i32, %arg1: i32) -> (i32, i32) {
    %c0_i32 = arith.constant 0 : i32
    %c0_i32_0 = arith.constant 0 : i32
    return %arg1, %c0_i32 : i32, i32
  }
  func.func @transform_2(%arg0: i32, %arg1: i32) -> (i32, i32) {
    %c0_i32 = arith.constant 0 : i32
    %c0_i32_0 = arith.constant 0 : i32
    %c0_i32_1 = arith.constant 0 : i32
    return %c0_i32, %c0_i32_0 : i32, i32
  }
  func.func @transform_3(%arg0: i32, %arg1: i32) -> (i32, i32) {
    %c0_i32 = arith.constant 0 : i32
    %c0_i32_0 = arith.constant 0 : i32
    %c0_i32_1 = arith.constant 0 : i32
    return %c0_i32, %c0_i32_0 : i32, i32
  }
  func.func @transform_4(%arg0: i32, %arg1: i32) -> (i32, i32) {
    %c0_i32 = arith.constant 0 : i32
    %c0_i32_0 = arith.constant 0 : i32
    %c0_i32_1 = arith.constant 0 : i32
    return %c0_i32, %c0_i32_0 : i32, i32
  }
  func.func @transform_5(%arg0: i32, %arg1: i32) -> (i32, i32) {
    %c0_i32 = arith.constant 0 : i32
    %c0_i32_0 = arith.constant 0 : i32
    %c0_i32_1 = arith.constant 0 : i32
    return %c0_i32, %c0_i32_0 : i32, i32
  }
  func.func @transform_6(%arg0: i32, %arg1: i32) -> (i32, i32) {
    %c0_i32 = arith.constant 0 : i32
    %c0_i32_0 = arith.constant 0 : i32
    %c0_i32_1 = arith.constant 0 : i32
    return %c0_i32, %c0_i32_0 : i32, i32
  }
  func.func @transform_7(%arg0: i32, %arg1: i32) -> (i32, i32) {
    %c0_i32 = arith.constant 0 : i32
    %c0_i32_0 = arith.constant 0 : i32
    return %arg0, %c0_i32 : i32, i32
  }
}

</mosaic_0001>

<bundles_post_ra>
// kernel: _roi_head_call.1
= control target key start
LH: loop header
LB: loop body
LE: loop exit
PB: predicated region body
PF: predicated region fallthrough
CT: control target
= control target key end

     0   :  { %12 = vsyncpa [#allocation4], 0  ;;  %s2925_s0 = inlined_call_operand.hbm [shape: f32[200,512], index: 0, kind: input, shape index: {}]   ;;  %s2926_s1 = inlined_call_operand.hbm [shape: bf16[512,256], index: 1, kind: input, shape index: {}]   ;;  %s2927_s2 = inlined_call_operand.vmem [shape: f32[1,256], index: 2, kind: input, shape index: {}]   ;;  %s2928_s3 = inlined_call_operand.hbm [shape: bf16[256,256], index: 3, kind: input, shape index: {}]   ;;  %s2929_s4 = inlined_call_operand.vmem [shape: f32[1,256], index: 4, kind: input, shape index: {}]   ;;  %s2930_s5 = inlined_call_operand.hbm [shape: bf16[256,128], index: 5, kind: input, shape index: {}]   ;;  %s2931_s6 = inlined_call_operand.vmem [shape: f32[1,128], index: 6, kind: input, shape index: {}]   ;;  %s2932_s7 = inlined_call_operand.hbm [shape: f32[200,128], index: 7, kind: output, shape index: {}]  }
   0x1   :  { %13 = vsyncpa [#allocation7], 0 }
   0x2   :  { %14 = vsyncpa [#allocation10], 0 }
   0x3   :  { %15 = vsyncpa [#allocation5], 0  ;;  %s2636_s24 = smov [#allocation6]   ;;  %s2518_s28 = scalar_lea.hbm %s2926_s1, 8192 }
   0x4   :  { %s33_s25 = sshll.u32 %s2636_s24, 4  ;;  %p2519_p0 = scmp.ne.s32.totalorder %s2926_s1, %s2518_s28  ;;  %s34_s25 = int_to_ptr.vmem [resolvable:$true] %s33_s25 }
   0x5   :  { %p2522_p1 = scmp.lt.u32.totalorder %s2518_s28, %s2926_s1 }
   0x7   :  { %p2524_p2 = pnand %p2522_p1, %p2519_p0 }
   0x9   :  { %2527 = shalt.err (!%p2524_p2)
}
   0xa   :  { %s2528_s10 = scalar_lea.vmem %s34_s25, 8192  ;;  %p2533_p4 = scmp.lt.s32.totalorder %s34_s25, %s34_s25 }
   0xb   :  { %p2529_p3 = scmp.ne.s32.totalorder %s34_s25, %s2528_s10  ;;  %p2534_p5 = scmp.lt.s32.totalorder %s2528_s10, %s2528_s10 }
   0xd   :  { %p2535_p6 = por %p2534_p5, %p2533_p4 }
   0xf   :  { %p2536_p7 = pnand %p2535_p6, %p2529_p3 }
  0x11   :  { %2539 = shalt.err (!%p2536_p7)
}
  0x12   :  { %s2637_s11 = smov 128   ;;  %s2638_s12 = smov 8  }
  0x13   :  { %39 = dma.hbm_to_vmem [thread:$0]  %s2926_s1, 8192, %s34_s25, [#allocation7], %s2637_s11, %s2637_s11, %s2638_s12  }
  0x14   :  { %s2639_s15 = smov [#allocation3]   ;;  %s2540_s19 = scalar_lea.hbm %s2925_s0, 12800 }
  0x15   :  { %s21_s16 = sshll.u32 %s2639_s15, 4  ;;  %p2541_p8 = scmp.ne.s32.totalorder %s2925_s0, %s2540_s19  ;;  %s22_s16 = int_to_ptr.vmem [resolvable:$true] %s21_s16 }
  0x16   :  { %p2544_p9 = scmp.lt.u32.totalorder %s2540_s19, %s2925_s0 }
  0x18   :  { %p2546_p10 = pnand %p2544_p9, %p2541_p8 }
  0x1a   :  { %2549 = shalt.err (!%p2546_p10)
}
  0x1b   :  { %s2550_s24 = scalar_lea.vmem %s22_s16, 12800  ;;  %p2555_p12 = scmp.lt.s32.totalorder %s22_s16, %s22_s16 }
  0x1c   :  { %p2551_p11 = scmp.ne.s32.totalorder %s22_s16, %s2550_s24  ;;  %p2556_p13 = scmp.lt.s32.totalorder %s2550_s24, %s2550_s24 }
  0x1e   :  { %p2557_p0 = por %p2556_p13, %p2555_p12 }
  0x20   :  { %p2558_p1 = pnand %p2557_p0, %p2551_p11 }
  0x22   :  { %2561 = shalt.err (!%p2558_p1)
}
  0x23   :  { %s2640_s1 = smov 512   ;;  %s2641_s25 = smov 32  }
  0x24   :  { %27 = dma.hbm_to_vmem [thread:$0]  %s2925_s0, 12800, %s22_s16, [#allocation4], %s2640_s1, %s2640_s1, %s2641_s25  }
  0x25   :  { %s2642_s28 = smov [#allocation8]   ;;  %s2643_s30 = smov [#allocation9]  }
  0x26   :  { %s47_s29 = sshll.u32 %s2642_s28, 4  ;;  %s61_s8 = sshll.u32 %s2643_s30, 4  ;;  %s48_s29 = int_to_ptr.vmem [resolvable:$true] %s47_s29  ;;  %s2714_s8 = int_to_ptr.vmem [resolvable:$true] %s61_s8 }
  0x27   :  { %s2562_s13 = scalar_lea.hbm %s2928_s3, 4096 }
  0x28   :  { %p2563_p2 = scmp.ne.s32.totalorder %s2928_s3, %s2562_s13  ;;  %p2566_p3 = scmp.lt.u32.totalorder %s2562_s13, %s2928_s3 }
  0x2a   :  { %p2568_p4 = pnand %p2566_p3, %p2563_p2 }
  0x2c   :  { %2571 = shalt.err (!%p2568_p4)
}
  0x2d   :  { %s2572_s0 = scalar_lea.vmem %s48_s29, 4096  ;;  %p2577_p6 = scmp.lt.s32.totalorder %s48_s29, %s48_s29 }
  0x2e   :  { %p2573_p5 = scmp.ne.s32.totalorder %s48_s29, %s2572_s0  ;;  %p2578_p7 = scmp.lt.s32.totalorder %s2572_s0, %s2572_s0 }
  0x30   :  { %p2579_p8 = por %p2578_p7, %p2577_p6 }
  0x32   :  { %p2580_p9 = pnand %p2579_p8, %p2573_p5 }
  0x34   :  { %2583 = shalt.err (!%p2580_p9)
}
  0x35   :  { %53 = dma.hbm_to_vmem [thread:$0]  %s2928_s3, 4096, %s48_s29, [#allocation7], %s2637_s11, %s2637_s11, %s2638_s12  }
  0x36   :  { %s2584_s22 = scalar_lea.hbm %s2930_s5, 2048 }
  0x37   :  { %p2585_p10 = scmp.ne.s32.totalorder %s2930_s5, %s2584_s22  ;;  %p2588_p11 = scmp.lt.u32.totalorder %s2584_s22, %s2930_s5 }
  0x39   :  { %p2590_p12 = pnand %p2588_p11, %p2585_p10 }
  0x3b   :  { %2593 = shalt.err (!%p2590_p12)
}
  0x3c   :  { %s2594_s26 = scalar_lea.vmem %s2714_s8, 2048  ;;  %p2599_p0 = scmp.lt.s32.totalorder %s2714_s8, %s2714_s8 }
  0x3d   :  { %p2595_p13 = scmp.ne.s32.totalorder %s2714_s8, %s2594_s26  ;;  %p2600_p1 = scmp.lt.s32.totalorder %s2594_s26, %s2594_s26 }
  0x3f   :  { %p2601_p2 = por %p2600_p1, %p2599_p0 }
  0x41   :  { %p2602_p3 = pnand %p2601_p2, %p2595_p13 }
  0x43   :  { %2605 = shalt.err (!%p2602_p3)
}
  0x44   :  { %s2644_s3 = smov 64   ;;  %s2645_s27 = smov 4  }
  0x45   :  { %67 = dma.hbm_to_vmem [thread:$0]  %s2930_s5, 2048, %s2714_s8, [#allocation10], %s2644_s3, %s2644_s3, %s2645_s27  }
  0x46   :  { %2628 = dma.done.wait [#allocation4], 12800  }
  0x47   :  { %2629 = vsyncadd [#allocation4], 4294954496 }
  0x48   :  { %2630 = dma.done.wait [#allocation7], 12288  }
  0x49   :  { %2631 = vsyncadd [#allocation7], 4294955008 }
  0x4a   :  { %2632 = dma.done.wait [#allocation10], 2048  }
  0x4b   :  { %2633 = vsyncadd [#allocation10], 4294965248  ;;  %v2358_v0 = vld [vmem:[#allocation6 + $0x4] ss:$8 sps:$4 sm:$0xff]   ;;  %v2360_v1 = vld [vmem:[#allocation6] ss:$8 sps:$4 sm:$0xff]  }
  0x4c   :  { %723 = vmatprep.subr.bf16.mxu0 %v2358_v0  ;;  %v2361_v2 = vld [vmem:[#allocation6 + $0x14] ss:$8 sps:$4 sm:$0xff]   ;;  %v2363_v3 = vld [vmem:[#allocation6 + $0x10] ss:$8 sps:$4 sm:$0xff]   ;;  %v2364_v4 = vld [vmem:[#allocation6 + $0x24] ss:$8 sps:$4 sm:$0xff]  }
  0x4d   :  { %724 = vmatpush1.bf16.msra.mxu0 %v2360_v1  ;;  %v2366_v5 = vld [vmem:[#allocation6 + $0x20] ss:$8 sps:$4 sm:$0xff]   ;;  %v2367_v6 = vld [vmem:[#allocation6 + $0x34] ss:$8 sps:$4 sm:$0xff]   ;;  %v2369_v7 = vld [vmem:[#allocation6 + $0x30] ss:$8 sps:$4 sm:$0xff]  }
  0x4e   :  { %725 = vmatprep.subr.bf16.mxu0 %v2361_v2  ;;  %v2370_v8 = vld [vmem:[#allocation6 + $0x44] ss:$8 sps:$4 sm:$0xff]   ;;  %v2372_v9 = vld [vmem:[#allocation6 + $0x40] ss:$8 sps:$4 sm:$0xff]   ;;  %v2373_v10 = vld [vmem:[#allocation6 + $0x54] ss:$8 sps:$4 sm:$0xff]  }
  0x4f   :  { %v2375_v11 = vld [vmem:[#allocation6 + $0x50] ss:$8 sps:$4 sm:$0xff]   ;;  %v2376_v12 = vld [vmem:[#allocation6 + $0x64] ss:$8 sps:$4 sm:$0xff]   ;;  %v2378_v16 = vld [vmem:[#allocation6 + $0x60] ss:$8 sps:$4 sm:$0xff]  }
  0x50   :  { %v188_v13 = vld [vmem:[#allocation3 + $0x8] sm:$0xff]  ;;  %v2379_v17 = vld [vmem:[#allocation6 + $0x74] ss:$8 sps:$4 sm:$0xff]   ;;  %v2381_v18 = vld [vmem:[#allocation6 + $0x70] ss:$8 sps:$4 sm:$0xff]  }
  0x51   :  { %726 = vmatpush1.bf16.msra.mxu0 %v2363_v3  ;;  %v192_v14 = vld [vmem:[#allocation3 + $0x28] sm:$0xff]  ;;  %v2385_v21 = vld [vmem:[#allocation6 + $0x94] ss:$8 sps:$4 sm:$0xff]   ;;  %v2387_v22 = vld [vmem:[#allocation6 + $0x90] ss:$8 sps:$4 sm:$0xff]  }
  0x52   :  { %727 = vmatprep.subr.bf16.mxu0 %v2364_v4  ;;  %v288_v15 = vpack.c.bf16 %v192_v14, %v188_v13  ;;  %v2382_v19 = vld [vmem:[#allocation6 + $0x84] ss:$8 sps:$4 sm:$0xff]   ;;  %v2384_v20 = vld [vmem:[#allocation6 + $0x80] ss:$8 sps:$4 sm:$0xff]   ;;  %v2391_v25 = vld [vmem:[#allocation6 + $0xb4] ss:$8 sps:$4 sm:$0xff]  }
  0x53   :  { %v2388_v23 = vld [vmem:[#allocation6 + $0xa4] ss:$8 sps:$4 sm:$0xff]   ;;  %v2390_v24 = vld [vmem:[#allocation6 + $0xa0] ss:$8 sps:$4 sm:$0xff]   ;;  %v2393_v26 = vld [vmem:[#allocation6 + $0xb0] ss:$8 sps:$4 sm:$0xff]  }
  0x54   :  { %755 = vmatprep.mubr.bf16.mxu0 %v288_v15  ;;  %v2394_v27 = vld [vmem:[#allocation6 + $0xc4] ss:$8 sps:$4 sm:$0xff]   ;;  %v2396_v28 = vld [vmem:[#allocation6 + $0xc0] ss:$8 sps:$4 sm:$0xff]   ;;  %v2397_v29 = vld [vmem:[#allocation6 + $0xd4] ss:$8 sps:$4 sm:$0xff]  }
  0x55   :  { %728 = vmatpush1.bf16.msra.mxu0 %v2366_v5  ;;  %v2399_v30 = vld [vmem:[#allocation6 + $0xd0] ss:$8 sps:$4 sm:$0xff]   ;;  %v2400_v31 = vld [vmem:[#allocation6 + $0xe4] ss:$8 sps:$4 sm:$0xff]   ;;  %v2402_v32 = vld [vmem:[#allocation6 + $0xe0] ss:$8 sps:$4 sm:$0xff]  }
  0x56   :  { %729 = vmatprep.subr.bf16.mxu0 %v2367_v6  ;;  %v2403_v33 = vld [vmem:[#allocation6 + $0xf4] ss:$8 sps:$4 sm:$0xff]   ;;  %v2405_v34 = vld [vmem:[#allocation6 + $0xf0] ss:$8 sps:$4 sm:$0xff]   ;;  %v187_v35 = vld [vmem:[#allocation3] sm:$0xff] }
  0x57   :  { %v191_v36 = vld [vmem:[#allocation3 + $0x20] sm:$0xff]  ;;  %v196_v38 = vld [vmem:[#allocation3 + $0x48] sm:$0xff]  ;;  %v2411_v43 = vld [vmem:[#allocation6 + $0x114] ss:$8 sps:$4 sm:$0xff]  }
  0x58   :  { %v2408_v37 = vld [vmem:[#allocation6 + $0x104] ss:$8 sps:$4 sm:$0xff]   ;;  %v287_v40 = vpack.c.bf16 %v191_v36, %v187_v35  ;;  %v2406_v41 = vld [vmem:[#allocation6 + $0x100] ss:$8 sps:$4 sm:$0xff]   ;;  %v2409_v44 = vld [vmem:[#allocation6 + $0x110] ss:$8 sps:$4 sm:$0xff]  }
  0x59   :  { %730 = vmatpush1.bf16.msra.mxu0 %v2369_v7  ;;  %v200_v39 = vld [vmem:[#allocation3 + $0x68] sm:$0xff]  ;;  %v195_v45 = vld [vmem:[#allocation3 + $0x40] sm:$0xff]  ;;  %v2417_v52 = vld [vmem:[#allocation6 + $0x134] ss:$8 sps:$4 sm:$0xff]  }
  0x5a   :  { %731 = vmatprep.subr.bf16.mxu0 %v2370_v8  ;;  %v292_v42 = vpack.c.bf16 %v200_v39, %v196_v38  ;;  %v199_v46 = vld [vmem:[#allocation3 + $0x60] sm:$0xff]  ;;  %v204_v48 = vld [vmem:[#allocation3 + $0x88] sm:$0xff]  ;;  %v2415_v56 = vld [vmem:[#allocation6 + $0x130] ss:$8 sps:$4 sm:$0xff]  }
  0x5b   :  { %v2414_v47 = vld [vmem:[#allocation6 + $0x124] ss:$8 sps:$4 sm:$0xff]   ;;  %v2412_v50 = vld [vmem:[#allocation6 + $0x120] ss:$8 sps:$4 sm:$0xff]   ;;  %v291_v51 = vpack.c.bf16 %v199_v46, %v195_v45  ;;  %v2423_v62 = vld [vmem:[#allocation6 + $0x154] ss:$8 sps:$4 sm:$0xff]  }
  0x5c   :  { %v208_v49 = vld [vmem:[#allocation3 + $0xa8] sm:$0xff]  ;;  %v203_v54 = vld [vmem:[#allocation3 + $0x80] sm:$0xff]  ;;  %v2421_v4 = vld [vmem:[#allocation6 + $0x150] ss:$8 sps:$4 sm:$0xff]  }
  0x5d   :  { %732 = vmatpush1.bf16.msra.mxu0 %v2372_v9  ;;  %v296_v53 = vpack.c.bf16 %v208_v49, %v204_v48  ;;  %v207_v55 = vld [vmem:[#allocation3 + $0xa0] sm:$0xff]  ;;  %v212_v57 = vld [vmem:[#allocation3 + $0xc8] sm:$0xff]  ;;  %v2429_v8 = vld [vmem:[#allocation6 + $0x174] ss:$8 sps:$4 sm:$0xff]  }
  0x5e   :  { %733 = vmatprep.subr.bf16.mxu0 %v2373_v10  ;;  %v216_v58 = vld [vmem:[#allocation3 + $0xe8] sm:$0xff]  ;;  %v295_v61 = vpack.c.bf16 %v207_v55, %v203_v54  ;;  %v211_v0 = vld [vmem:[#allocation3 + $0xc0] sm:$0xff]  ;;  %v2447_v39 = vld [vmem:[#allocation6 + $0x1d4] ss:$8 sps:$4 sm:$0xff]  }
  0x5f   :  { %v2420_v59 = vld [vmem:[#allocation6 + $0x144] ss:$8 sps:$4 sm:$0xff]   ;;  %v2418_v60 = vld [vmem:[#allocation6 + $0x140] ss:$8 sps:$4 sm:$0xff]   ;;  %v300_v63 = vpack.c.bf16 %v216_v58, %v212_v57  ;;  %v2453_v49 = vld [vmem:[#allocation6 + $0x1f4] ss:$8 sps:$4 sm:$0xff]  }
  0x60   :  { %v215_v1 = vld [vmem:[#allocation3 + $0xe0] sm:$0xff]  ;;  %v220_v2 = vld [vmem:[#allocation3 + $0x108] sm:$0xff] }
  0x61   :  { %734 = vmatpush1.bf16.msra.mxu0 %v2375_v11  ;;  %v224_v3 = vld [vmem:[#allocation3 + $0x128] sm:$0xff]  ;;  %v299_v7 = vpack.c.bf16 %v215_v1, %v211_v0  ;;  %v219_v10 = vld [vmem:[#allocation3 + $0x100] sm:$0xff]  ;;  %v2457_v1 = vld [vmem:[#allocation8 + $0x14] ss:$8 sps:$4 sm:$0xff]  }
  0x62   :  { %735 = vmatprep.subr.bf16.mxu0 %v2376_v12  ;;  %v2426_v5 = vld [vmem:[#allocation6 + $0x164] ss:$8 sps:$4 sm:$0xff]   ;;  %v2424_v6 = vld [vmem:[#allocation6 + $0x160] ss:$8 sps:$4 sm:$0xff]   ;;  %v304_v9 = vpack.c.bf16 %v224_v3, %v220_v2  ;;  %v2427_v12 = vld [vmem:[#allocation6 + $0x170] ss:$8 sps:$4 sm:$0xff]  }
  0x63   :  { %v223_v11 = vld [vmem:[#allocation3 + $0x120] sm:$0xff]  ;;  %v228_v13 = vld [vmem:[#allocation3 + $0x148] sm:$0xff] }
  0x64   :  { %v232_v14 = vld [vmem:[#allocation3 + $0x168] sm:$0xff]  ;;  %v259_v57 = vld [vmem:[#allocation3 + $0x240] sm:$0xff] }
  0x65   :  { %736 = vmatpush1.bf16.msra.mxu0 %v2378_v16  ;;  %v2432_v15 = vld [vmem:[#allocation6 + $0x184] ss:$8 sps:$4 sm:$0xff]   ;;  %v303_v16 = vpack.c.bf16 %v223_v11, %v219_v10  ;;  %v2442_v38 = vld [vmem:[#allocation6 + $0x1c0] ss:$8 sps:$4 sm:$0xff]   ;;  %v2463_v11 = vld [vmem:[#allocation8 + $0x34] ss:$8 sps:$4 sm:$0xff]  }
  0x66   :  { %737 = vmatprep.subr.bf16.mxu0 %v2379_v17  ;;  %v308_v17 = vpack.c.bf16 %v232_v14, %v228_v13  ;;  %v2444_v35 = vld [vmem:[#allocation6 + $0x1c4] ss:$8 sps:$4 sm:$0xff]   ;;  %v2448_v48 = vld [vmem:[#allocation6 + $0x1e0] ss:$8 sps:$4 sm:$0xff]  }
  0x67   :  { %v2450_v45 = vld [vmem:[#allocation6 + $0x1e4] ss:$8 sps:$4 sm:$0xff]   ;;  %v2456_v0 = vld [vmem:[#allocation8] ss:$8 sps:$4 sm:$0xff]  }
  0x68   :  { %v264_v54 = vld [vmem:[#allocation3 + $0x268] sm:$0xff]  ;;  %v263_v58 = vld [vmem:[#allocation3 + $0x260] sm:$0xff] }
  0x69   :  { %738 = vmatpush1.bf16.msra.mxu0 %v2381_v18  ;;  %v2430_v18 = vld [vmem:[#allocation6 + $0x180] ss:$8 sps:$4 sm:$0xff]  }
  0x6a   :  { %739 = vmatprep.subr.bf16.mxu0 %v2382_v19  ;;  %v2435_v19 = vld [vmem:[#allocation6 + $0x194] ss:$8 sps:$4 sm:$0xff]   ;;  %v267_v2 = vld [vmem:[#allocation3 + $0x280] sm:$0xff]  ;;  %v284_v14 = vld [vmem:[#allocation3 + $0x308] sm:$0xff] }
  0x6b   :  { %v271_v3 = vld [vmem:[#allocation3 + $0x2a0] sm:$0xff] }
  0x6c   :  { %v2462_v10 = vld [vmem:[#allocation8 + $0x20] ss:$8 sps:$4 sm:$0xff]  }
  0x6d   :  { %740 = vmatpush1.bf16.msra.mxu0 %v2384_v20  ;;  %v227_v20 = vld [vmem:[#allocation3 + $0x140] sm:$0xff] }
  0x6e   :  { %741 = vmatprep.subr.bf16.mxu0 %v2385_v21  ;;  %v231_v21 = vld [vmem:[#allocation3 + $0x160] sm:$0xff] }
  0x6f   :  { %v279_v13 = vld [vmem:[#allocation3 + $0x2e0] sm:$0xff] }
  0x71   :  { %742 = vmatpush1.bf16.msra.mxu0 %v2387_v22  ;;  %v2433_v22 = vld [vmem:[#allocation6 + $0x190] ss:$8 sps:$4 sm:$0xff]  }
  0x72   :  { %743 = vmatprep.subr.bf16.mxu0 %v2388_v23  ;;  %v236_v23 = vld [vmem:[#allocation3 + $0x188] sm:$0xff] }
  0x75   :  { %744 = vmatpush1.bf16.msra.mxu0 %v2390_v24  ;;  %v240_v24 = vld [vmem:[#allocation3 + $0x1a8] sm:$0xff] }
  0x76   :  { %745 = vmatprep.subr.bf16.mxu0 %v2391_v25  ;;  %v2438_v25 = vld [vmem:[#allocation6 + $0x1a4] ss:$8 sps:$4 sm:$0xff]  }
  0x79   :  { %746 = vmatpush1.bf16.msra.mxu0 %v2393_v26  ;;  %v307_v26 = vpack.c.bf16 %v231_v21, %v227_v20  ;;  %v2469_v20 = vld [vmem:[#allocation8 + $0x54] ss:$8 sps:$4 sm:$0xff]   ;;  %v283_v21 = vld [vmem:[#allocation3 + $0x300] sm:$0xff] }
  0x7a   :  { %747 = vmatprep.subr.bf16.mxu0 %v2394_v27  ;;  %v312_v27 = vpack.c.bf16 %v240_v24, %v236_v23  ;;  %v194_v23 = vld [vmem:[#allocation3 + $0x38] sm:$0xff] }
  0x7b   :  { %v2471_v24 = vld [vmem:[#allocation8 + $0x50] ss:$8 sps:$4 sm:$0xff]  }
  0x7d   :  { %748 = vmatpush1.bf16.msra.mxu0 %v2396_v28  ;;  %v2436_v28 = vld [vmem:[#allocation6 + $0x1a0] ss:$8 sps:$4 sm:$0xff]  }
  0x7e   :  { %749 = vmatprep.subr.bf16.mxu0 %v2397_v29  ;;  %v2441_v29 = vld [vmem:[#allocation6 + $0x1b4] ss:$8 sps:$4 sm:$0xff]  }
  0x81   :  { %750 = vmatpush1.bf16.msra.mxu0 %v2399_v30  ;;  %v235_v30 = vld [vmem:[#allocation3 + $0x180] sm:$0xff] }
  0x82   :  { %751 = vmatprep.subr.bf16.mxu0 %v2400_v31  ;;  %v239_v31 = vld [vmem:[#allocation3 + $0x1a0] sm:$0xff] }
  0x83   :  { %v311_v36 = vpack.c.bf16 %v239_v31, %v235_v30  ;;  %v189_v30 = vld [vmem:[#allocation3 + $0x10] sm:$0xff] }
  0x84   :  { %v193_v31 = vld [vmem:[#allocation3 + $0x30] sm:$0xff] }
  0x85   :  { %752 = vmatpush1.bf16.msra.mxu0 %v2402_v32  ;;  %v2439_v32 = vld [vmem:[#allocation6 + $0x1b0] ss:$8 sps:$4 sm:$0xff]  }
  0x86   :  { %753 = vmatprep.subr.bf16.mxu0 %v2403_v33  ;;  %v244_v33 = vld [vmem:[#allocation3 + $0x1c8] sm:$0xff] }
  0x89   :  { %754 = vmatpush1.bf16.msra.mxu0 %v2405_v34  ;;  %v248_v34 = vld [vmem:[#allocation3 + $0x1e8] sm:$0xff] }
  0x8a   :  { %884 = vmatprep.subr.bf16.mxu0 %v2408_v37  ;;  %v316_v37 = vpack.c.bf16 %v248_v34, %v244_v33  ;;  %v202_v33 = vld [vmem:[#allocation3 + $0x78] sm:$0xff] }
  0x8b   :  { %v2477_v34 = vld [vmem:[#allocation8 + $0x70] ss:$8 sps:$4 sm:$0xff]  }
  0x8c   :  { %756 = vmatmul.mubr.bf16.vlgmr.msra.gmra.mrb[0].mxu0 %v287_v40  ;;  %v243_v40 = vld [vmem:[#allocation3 + $0x1c0] sm:$0xff] }
  0x8d   :  { %885 = vmatpush1.bf16.msra.mxu0 %v2406_v41  ;;  %765 = vmatprep.mubr.bf16.mxu0 %v292_v42  ;;  %v247_v41 = vld [vmem:[#allocation3 + $0x1e0] sm:$0xff]  ;;  %v2445_v42 = vld [vmem:[#allocation6 + $0x1d0] ss:$8 sps:$4 sm:$0xff]  }
  0x8e   :  { %886 = vmatprep.subr.bf16.mxu0 %v2411_v43  ;;  %v252_v43 = vld [vmem:[#allocation3 + $0x208] sm:$0xff]  ;;  %v315_v46 = vpack.c.bf16 %v247_v41, %v243_v40  ;;  %v197_v40 = vld [vmem:[#allocation3 + $0x50] sm:$0xff] }
  0x8f   :  { %v201_v41 = vld [vmem:[#allocation3 + $0x70] sm:$0xff] }
  0x91   :  { %887 = vmatpush1.bf16.msra.mxu0 %v2409_v44  ;;  %v256_v44 = vld [vmem:[#allocation3 + $0x228] sm:$0xff] }
  0x92   :  { %888 = vmatprep.subr.bf16.mxu0 %v2414_v47  ;;  %v320_v47 = vpack.c.bf16 %v256_v44, %v252_v43  ;;  %v210_v43 = vld [vmem:[#allocation3 + $0xb8] sm:$0xff] }
  0x93   :  { %v2483_v44 = vld [vmem:[#allocation8 + $0x90] ss:$8 sps:$4 sm:$0xff]  }
  0x94   :  { %766 = vmatmul.mubr.bf16.gmra.mrb[4].mxu0 %v291_v51  ;;  %v255_v51 = vld [vmem:[#allocation3 + $0x220] sm:$0xff] }
  0x95   :  { %889 = vmatpush1.bf16.msra.mxu0 %v2412_v50  ;;  %775 = vmatprep.mubr.bf16.mxu0 %v296_v53  ;;  %v251_v50 = vld [vmem:[#allocation3 + $0x200] sm:$0xff]  ;;  %v260_v53 = vld [vmem:[#allocation3 + $0x248] sm:$0xff] }
  0x96   :  { %890 = vmatprep.subr.bf16.mxu0 %v2417_v52  ;;  %v2451_v52 = vld [vmem:[#allocation6 + $0x1f0] ss:$8 sps:$4 sm:$0xff]   ;;  %v319_v55 = vpack.c.bf16 %v255_v51, %v251_v50 }
  0x97   :  { %v205_v50 = vld [vmem:[#allocation3 + $0x90] sm:$0xff] }
  0x98   :  { %v209_v51 = vld [vmem:[#allocation3 + $0xb0] sm:$0xff] }
  0x99   :  { %891 = vmatpush1.bf16.msra.mxu0 %v2415_v56  ;;  %v324_v56 = vpack.c.bf16 %v264_v54, %v260_v53  ;;  %v218_v53 = vld [vmem:[#allocation3 + $0xf8] sm:$0xff]  ;;  %v297_v54 = vpack.c.bf16 %v209_v51, %v205_v50  ;;  %v2498_v51 = vld [vmem:[#allocation8 + $0xe0] ss:$8 sps:$4 sm:$0xff]  }
  0x9a   :  { %892 = vmatprep.subr.bf16.mxu0 %v2420_v59  ;;  %v268_v59 = vld [vmem:[#allocation3 + $0x288] sm:$0xff] }
  0x9c   :  { %776 = vmatmul.mubr.bf16.gmra.mrb[8].mxu0 %v295_v61  ;;  %v323_v61 = vpack.c.bf16 %v263_v58, %v259_v57  ;;  %v217_v57 = vld [vmem:[#allocation3 + $0xf0] sm:$0xff]  ;;  %v222_v58 = vld [vmem:[#allocation3 + $0x118] sm:$0xff] }
  0x9d   :  { %785 = vmatprep.mubr.bf16.mxu0 %v300_v63  ;;  %893 = vmatpush1.bf16.msra.mxu0 %v2418_v60  ;;  %v272_v60 = vld [vmem:[#allocation3 + $0x2a8] sm:$0xff] }
  0x9e   :  { %894 = vmatprep.subr.bf16.mxu0 %v2423_v62  ;;  %v328_v62 = vpack.c.bf16 %v272_v60, %v268_v59  ;;  %v2454_v63 = vld [vmem:[#allocation8 + $0x4] ss:$8 sps:$4 sm:$0xff]   ;;  %v226_v59 = vld [vmem:[#allocation3 + $0x138] sm:$0xff] }
  0x9f   :  { %1540 = vmatprep.subr.bf16.mxu1 %v2454_v63  ;;  %v225_v63 = vld [vmem:[#allocation3 + $0x130] sm:$0xff] }
  0xa0   :  { %1541 = vmatpush1.bf16.msra.mxu1 %v2456_v0  ;;  %v230_v0 = vld [vmem:[#allocation3 + $0x158] sm:$0xff] }
  0xa1   :  { %895 = vmatpush1.bf16.msra.mxu0 %v2421_v4  ;;  %v276_v4 = vld [vmem:[#allocation3 + $0x2c8] sm:$0xff]  ;;  %1542 = vmatprep.subr.bf16.mxu1 %v2457_v1  ;;  %v234_v1 = vld [vmem:[#allocation3 + $0x178] sm:$0xff] }
  0xa2   :  { %896 = vmatprep.subr.bf16.mxu0 %v2426_v5  ;;  %v280_v5 = vld [vmem:[#allocation3 + $0x2e8] sm:$0xff] }
  0xa4   :  { %786 = vmatmul.mubr.bf16.gmra.mrb[12].mxu0 %v299_v7  ;;  %v327_v7 = vpack.c.bf16 %v271_v3, %v267_v2  ;;  %v310_v3 = vpack.c.bf16 %v234_v1, %v230_v0 }
  0xa5   :  { %795 = vmatprep.mubr.bf16.mxu0 %v304_v9  ;;  %897 = vmatpush1.bf16.msra.mxu0 %v2424_v6  ;;  %v2459_v6 = vld [vmem:[#allocation8 + $0x10] ss:$8 sps:$4 sm:$0xff]   ;;  %v332_v9 = vpack.c.bf16 %v280_v5, %v276_v4 }
  0xa6   :  { %898 = vmatprep.subr.bf16.mxu0 %v2429_v8  ;;  %v2460_v8 = vld [vmem:[#allocation8 + $0x24] ss:$8 sps:$4 sm:$0xff]   ;;  %1543 = vmatpush1.bf16.msra.mxu1 %v2459_v6  ;;  %v229_v4 = vld [vmem:[#allocation3 + $0x150] sm:$0xff]  ;;  %v238_v6 = vld [vmem:[#allocation3 + $0x198] sm:$0xff] }
  0xa7   :  { %1544 = vmatprep.subr.bf16.mxu1 %v2460_v8  ;;  %v233_v5 = vld [vmem:[#allocation3 + $0x170] sm:$0xff] }
  0xa8   :  { %v309_v8 = vpack.c.bf16 %v233_v5, %v229_v4 }
  0xa9   :  { %899 = vmatpush1.bf16.msra.mxu0 %v2427_v12  ;;  %v275_v12 = vld [vmem:[#allocation3 + $0x2c0] sm:$0xff] }
  0xaa   :  { %900 = vmatprep.subr.bf16.mxu0 %v2432_v15  ;;  %1545 = vmatpush1.bf16.msra.mxu1 %v2462_v10  ;;  %v2465_v15 = vld [vmem:[#allocation8 + $0x30] ss:$8 sps:$4 sm:$0xff]  }
  0xab   :  { %1546 = vmatprep.subr.bf16.mxu1 %v2463_v11  ;;  %v237_v10 = vld [vmem:[#allocation3 + $0x190] sm:$0xff] }
  0xac   :  { %796 = vmatmul.mubr.bf16.gmra.mrb[16].mxu0 %v303_v16  ;;  %v331_v16 = vpack.c.bf16 %v279_v13, %v275_v12  ;;  %v241_v11 = vld [vmem:[#allocation3 + $0x1b0] sm:$0xff]  ;;  %v246_v12 = vld [vmem:[#allocation3 + $0x1d8] sm:$0xff] }
  0xad   :  { %805 = vmatprep.mubr.bf16.mxu0 %v308_v17  ;;  %901 = vmatpush1.bf16.msra.mxu0 %v2430_v18  ;;  %v2466_v17 = vld [vmem:[#allocation8 + $0x44] ss:$8 sps:$4 sm:$0xff]   ;;  %v336_v18 = vpack.c.bf16 %v284_v14, %v284_v14  ;;  %v250_v13 = vld [vmem:[#allocation3 + $0x1f8] sm:$0xff]  ;;  %v313_v14 = vpack.c.bf16 %v241_v11, %v237_v10 }
  0xae   :  { %902 = vmatprep.subr.bf16.mxu0 %v2435_v19  ;;  %1547 = vmatpush1.bf16.msra.mxu1 %v2465_v15  ;;  %v2468_v19 = vld [vmem:[#allocation8 + $0x40] ss:$8 sps:$4 sm:$0xff]   ;;  %v318_v15 = vpack.c.bf16 %v250_v13, %v246_v12 }
  0xaf   :  { %1548 = vmatprep.subr.bf16.mxu1 %v2466_v17  ;;  %v249_v17 = vld [vmem:[#allocation3 + $0x1f0] sm:$0xff] }
  0xb1   :  { %903 = vmatpush1.bf16.msra.mxu0 %v2433_v22  ;;  %v190_v22 = vld [vmem:[#allocation3 + $0x18] sm:$0xff] }
  0xb2   :  { %904 = vmatprep.subr.bf16.mxu0 %v2438_v25  ;;  %1549 = vmatpush1.bf16.msra.mxu1 %v2468_v19  ;;  %v335_v25 = vpack.c.bf16 %v283_v21, %v283_v21  ;;  %v258_v19 = vld [vmem:[#allocation3 + $0x238] sm:$0xff] }
  0xb3   :  { %1550 = vmatprep.subr.bf16.mxu1 %v2469_v20 }
  0xb4   :  { %806 = vmatmul.mubr.bf16.gmra.mrb[20].mxu0 %v307_v26  ;;  %v2472_v26 = vld [vmem:[#allocation8 + $0x64] ss:$8 sps:$4 sm:$0xff]  }
  0xb5   :  { %815 = vmatprep.mubr.bf16.mxu0 %v312_v27  ;;  %905 = vmatpush1.bf16.msra.mxu0 %v2436_v28  ;;  %v290_v27 = vpack.c.bf16 %v194_v23, %v190_v22  ;;  %v2474_v28 = vld [vmem:[#allocation8 + $0x60] ss:$8 sps:$4 sm:$0xff]   ;;  %v253_v22 = vld [vmem:[#allocation3 + $0x210] sm:$0xff] }
  0xb6   :  { %906 = vmatprep.subr.bf16.mxu0 %v2441_v29  ;;  %1551 = vmatpush1.bf16.msra.mxu1 %v2471_v24  ;;  %v2475_v29 = vld [vmem:[#allocation8 + $0x74] ss:$8 sps:$4 sm:$0xff]  }
  0xb7   :  { %1552 = vmatprep.subr.bf16.mxu1 %v2472_v26  ;;  %v257_v23 = vld [vmem:[#allocation3 + $0x230] sm:$0xff]  ;;  %v262_v24 = vld [vmem:[#allocation3 + $0x258] sm:$0xff] }
  0xb8   :  { %v321_v26 = vpack.c.bf16 %v257_v23, %v253_v22  ;;  %v2504_v22 = vld [vmem:[#allocation9 + $0x48] sm:$0xff]  }
  0xb9   :  { %907 = vmatpush1.bf16.msra.mxu0 %v2439_v32  ;;  %v198_v32 = vld [vmem:[#allocation3 + $0x58] sm:$0xff] }
  0xba   :  { %908 = vmatprep.subr.bf16.mxu0 %v2444_v35  ;;  %1553 = vmatpush1.bf16.msra.mxu1 %v2474_v28  ;;  %v289_v35 = vpack.c.bf16 %v193_v31, %v189_v30  ;;  %v261_v28 = vld [vmem:[#allocation3 + $0x250] sm:$0xff]  ;;  %v270_v30 = vld [vmem:[#allocation3 + $0x298] sm:$0xff] }
  0xbb   :  { %1554 = vmatprep.subr.bf16.mxu1 %v2475_v29  ;;  %v265_v29 = vld [vmem:[#allocation3 + $0x270] sm:$0xff]  ;;  %v274_v31 = vld [vmem:[#allocation3 + $0x2b8] sm:$0xff] }
  0xbc   :  { %816 = vmatmul.mubr.bf16.gmra.mrb[24].mxu0 %v311_v36  ;;  %v2478_v36 = vld [vmem:[#allocation8 + $0x84] ss:$8 sps:$4 sm:$0xff]  }
  0xbd   :  { %825 = vmatprep.mubr.bf16.mxu0 %v316_v37  ;;  %909 = vmatpush1.bf16.msra.mxu0 %v2442_v38  ;;  %v294_v37 = vpack.c.bf16 %v202_v33, %v198_v32  ;;  %v2480_v38 = vld [vmem:[#allocation8 + $0x80] ss:$8 sps:$4 sm:$0xff]   ;;  %v325_v32 = vpack.c.bf16 %v265_v29, %v261_v28  ;;  %v330_v33 = vpack.c.bf16 %v274_v31, %v270_v30  ;;  %v2506_v31 = vld [vmem:[#allocation9 + $0x50] sm:$0xff]  }
  0xbe   :  { %910 = vmatprep.subr.bf16.mxu0 %v2447_v39  ;;  %1555 = vmatpush1.bf16.msra.mxu1 %v2477_v34  ;;  %v2481_v39 = vld [vmem:[#allocation8 + $0x94] ss:$8 sps:$4 sm:$0xff]   ;;  %v2505_v28 = vld [vmem:[#allocation9 + $0x8] sm:$0xff]  }
  0xbf   :  { %1556 = vmatprep.subr.bf16.mxu1 %v2478_v36  ;;  %v269_v34 = vld [vmem:[#allocation3 + $0x290] sm:$0xff] }
  0xc0   :  { %v2489_v36 = vld [vmem:[#allocation8 + $0xb0] ss:$8 sps:$4 sm:$0xff]  }
  0xc1   :  { %911 = vmatpush1.bf16.msra.mxu0 %v2445_v42  ;;  %v206_v42 = vld [vmem:[#allocation3 + $0x98] sm:$0xff] }
  0xc2   :  { %912 = vmatprep.subr.bf16.mxu0 %v2450_v45  ;;  %1557 = vmatpush1.bf16.msra.mxu1 %v2480_v38  ;;  %v293_v45 = vpack.c.bf16 %v201_v41, %v197_v40  ;;  %v282_v38 = vld [vmem:[#allocation3 + $0x2f8] sm:$0xff]  ;;  %v2490_v40 = vld [vmem:[#allocation8 + $0xc4] ss:$8 sps:$4 sm:$0xff]  }
  0xc3   :  { %1558 = vmatprep.subr.bf16.mxu1 %v2481_v39 }
  0xc4   :  { %826 = vmatmul.mubr.bf16.gmra.mrb[28].mxu0 %v315_v46  ;;  %v2484_v46 = vld [vmem:[#allocation8 + $0xa4] ss:$8 sps:$4 sm:$0xff]  }
  0xc5   :  { %835 = vmatprep.mubr.bf16.mxu0 %v320_v47  ;;  %913 = vmatpush1.bf16.msra.mxu0 %v2448_v48  ;;  %v298_v47 = vpack.c.bf16 %v210_v43, %v206_v42  ;;  %v2486_v48 = vld [vmem:[#allocation8 + $0xa0] ss:$8 sps:$4 sm:$0xff]   ;;  %v2493_v43 = vld [vmem:[#allocation8 + $0xd4] ss:$8 sps:$4 sm:$0xff]  }
  0xc6   :  { %914 = vmatprep.subr.bf16.mxu0 %v2453_v49  ;;  %1559 = vmatpush1.bf16.msra.mxu1 %v2483_v44  ;;  %v2487_v49 = vld [vmem:[#allocation8 + $0xb4] ss:$8 sps:$4 sm:$0xff]   ;;  %v2492_v42 = vld [vmem:[#allocation8 + $0xc0] ss:$8 sps:$4 sm:$0xff]  }
  0xc7   :  { %1560 = vmatprep.subr.bf16.mxu1 %v2484_v46  ;;  %v277_v44 = vld [vmem:[#allocation3 + $0x2d0] sm:$0xff] }
  0xc8   :  { %v2495_v46 = vld [vmem:[#allocation8 + $0xd0] ss:$8 sps:$4 sm:$0xff]  }
  0xc9   :  { %915 = vmatpush1.bf16.msra.mxu0 %v2451_v52  ;;  %v214_v52 = vld [vmem:[#allocation3 + $0xd8] sm:$0xff] }
  0xca   :  { %1561 = vmatpush1.bf16.msra.mxu1 %v2486_v48 }
  0xcb   :  { %1562 = vmatprep.subr.bf16.mxu1 %v2487_v49  ;;  %v2496_v49 = vld [vmem:[#allocation8 + $0xe4] ss:$8 sps:$4 sm:$0xff]  }
  0xcc   :  { %836 = vmatmul.mubr.bf16.gmra.mrb[32].mxu0 %v319_v55  ;;  %v302_v55 = vpack.c.bf16 %v218_v53, %v214_v52  ;;  %v2499_v52 = vld [vmem:[#allocation8 + $0xf4] ss:$8 sps:$4 sm:$0xff]  }
  0xcd   :  { %845 = vmatprep.mubr.bf16.mxu0 %v324_v56  ;;  %v213_v56 = vld [vmem:[#allocation3 + $0xd0] sm:$0xff] }
  0xce   :  { %v301_v60 = vpack.c.bf16 %v217_v57, %v213_v56  ;;  %1563 = vmatpush1.bf16.msra.mxu1 %v2489_v36  ;;  %v285_v53 = vld [vmem:[#allocation3 + $0x310] sm:$0xff]  ;;  %v2502_v56 = vld [vmem:[#allocation9 + $0x40] sm:$0xff]   ;;  %v1200_v57 = vlaneseq }
  0xcf   :  { %1564 = vmatprep.subr.bf16.mxu1 %v2490_v40  ;;  %v2508_v40 = vld [vmem:[#allocation9 + $0x58] sm:$0xff]  }
  0xd2   :  { %1565 = vmatpush1.bf16.msra.mxu1 %v2492_v42 }
  0xd3   :  { %1566 = vmatprep.subr.bf16.mxu1 %v2493_v43 }
  0xd4   :  { %846 = vmatmul.mubr.bf16.gmra.mrb[36].mxu0 %v323_v61  ;;  %v306_v61 = vpack.c.bf16 %v226_v59, %v222_v58  ;;  %v2748_v58 = vshrl.u32 %v1200_v57, 7 }
  0xd5   :  { %855 = vmatprep.mubr.bf16.mxu0 %v328_v62  ;;  %v221_v62 = vld [vmem:[#allocation3 + $0x110] sm:$0xff] }
  0xd6   :  { %v305_v2 = vpack.c.bf16 %v225_v63, %v221_v62  ;;  %1567 = vmatpush1.bf16.msra.mxu1 %v2495_v46  ;;  %v1198_v63 = vld [vmem:[%s2927_s2] sm:$0x3]  ;;  %v1206_v0 = vsub.s32 1, %v2748_v58  ;;  %v2509_v46 = vld [vmem:[#allocation9 + $0x18] sm:$0xff]  }
  0xd7   :  { %1568 = vmatprep.subr.bf16.mxu1 %v2496_v49  ;;  %v2510_v49 = vld [vmem:[#allocation9 + $0x60] sm:$0xff]  }
  0xda   :  { %1569 = vmatpush1.bf16.msra.mxu1 %v2498_v51 }
  0xdb   :  { %1570 = vmatprep.subr.bf16.mxu1 %v2499_v52 }
  0xdc   :  { %856 = vmatmul.mubr.bf16.gmra.mrb[40].mxu0 %v327_v7  ;;  %v242_v7 = vld [vmem:[#allocation3 + $0x1b8] sm:$0xff] }
  0xdd   :  { %865 = vmatprep.mubr.bf16.mxu0 %v332_v9  ;;  %v314_v9 = vpack.c.bf16 %v242_v7, %v238_v6 }
  0xe4   :  { %866 = vmatmul.mubr.bf16.gmra.mrb[44].mxu0 %v331_v16  ;;  %v245_v16 = vld [vmem:[#allocation3 + $0x1d0] sm:$0xff] }
  0xe5   :  { %875 = vmatprep.mubr.bf16.mxu0 %v336_v18  ;;  %v254_v18 = vld [vmem:[#allocation3 + $0x218] sm:$0xff]  ;;  %v317_v20 = vpack.c.bf16 %v249_v17, %v245_v16 }
  0xe6   :  { %v322_v21 = vpack.c.bf16 %v258_v19, %v254_v18  ;;  %v2503_v19 = vld [vmem:[#allocation9] sm:$0xff]  }
  0xec   :  { %876 = vmatmul.mubr.bf16.gmra.mrb[48].mxu0 %v335_v25  ;;  %v266_v25 = vld [vmem:[#allocation3 + $0x278] sm:$0xff] }
  0xed   :  { %916 = vmatprep.mubr.bf16.mxu0 %v290_v27  ;;  %v326_v27 = vpack.c.bf16 %v266_v25, %v262_v24 }
  0xf4   :  { %917 = vmatmul.mubr.bf16.vlgmr.msra.gmra.mrb[0].mxu0 %v289_v35  ;;  %v273_v35 = vld [vmem:[#allocation3 + $0x2b0] sm:$0xff] }
  0xf5   :  { %926 = vmatprep.mubr.bf16.mxu0 %v294_v37  ;;  %v278_v37 = vld [vmem:[#allocation3 + $0x2d8] sm:$0xff]  ;;  %v329_v39 = vpack.c.bf16 %v273_v35, %v269_v34 }
  0xf6   :  { %v334_v41 = vpack.c.bf16 %v282_v38, %v278_v37  ;;  %v2507_v37 = vld [vmem:[#allocation9 + $0x10] sm:$0xff]  }
  0xfc   :  { %927 = vmatmul.mubr.bf16.gmra.mrb[4].mxu0 %v293_v45  ;;  %v281_v45 = vld [vmem:[#allocation3 + $0x2f0] sm:$0xff] }
  0xfd   :  { %936 = vmatprep.mubr.bf16.mxu0 %v298_v47  ;;  %v286_v47 = vld [vmem:[#allocation3 + $0x318] sm:$0xff]  ;;  %v333_v48 = vpack.c.bf16 %v281_v45, %v277_v44 }
  0xfe   :  { %v338_v50 = vpack.c.bf16 %v286_v47, %v286_v47 }
 0x104   :  { %937 = vmatmul.mubr.bf16.gmra.mrb[8].mxu0 %v297_v54  ;;  %v2501_v54 = vld [vmem:[#allocation8 + $0xf0] ss:$8 sps:$4 sm:$0xff]  }
 0x105   :  { %946 = vmatprep.mubr.bf16.mxu0 %v302_v55  ;;  %1571 = vmatpush1.bf16.msra.mxu1 %v2501_v54  ;;  %v337_v55 = vpack.c.bf16 %v285_v53, %v285_v53 }
 0x106   :  { %2205 = vmatprep.subr.bf16.mxu1 %v2502_v56 }
 0x10c   :  { %947 = vmatmul.mubr.bf16.gmra.mrb[12].mxu0 %v301_v60 }
 0x10d   :  { %956 = vmatprep.mubr.bf16.mxu0 %v306_v61  ;;  %v1202_v61 = vsub.s32 0, %v2748_v58 }
 0x114   :  { %957 = vmatmul.mubr.bf16.gmra.mrb[16].mxu0 %v305_v2  ;;  %v2761_v2 = vrot.slane %v1198_v63, %v1202_v61 }
 0x115   :  { %966 = vmatprep.mubr.bf16.mxu0 %v310_v3  ;;  %v2765_v3 = vrot.slane %v1198_v63, %v1206_v0 }
 0x11c   :  { %967 = vmatmul.mubr.bf16.gmra.mrb[20].mxu0 %v309_v8 }
 0x11d   :  { %976 = vmatprep.mubr.bf16.mxu0 %v314_v9 }
 0x124   :  { %977 = vmatmul.mubr.bf16.gmra.mrb[24].mxu0 %v313_v14 }
 0x125   :  { %986 = vmatprep.mubr.bf16.mxu0 %v318_v15 }
 0x12c   :  { %987 = vmatmul.mubr.bf16.gmra.mrb[28].mxu0 %v317_v20 }
 0x12d   :  { %996 = vmatprep.mubr.bf16.mxu0 %v322_v21 }
 0x134   :  { %997 = vmatmul.mubr.bf16.gmra.mrb[32].mxu0 %v321_v26 }
 0x135   :  { %1006 = vmatprep.mubr.bf16.mxu0 %v326_v27 }
 0x13c   :  { %1007 = vmatmul.mubr.bf16.gmra.mrb[36].mxu0 %v325_v32 }
 0x13d   :  { %1016 = vmatprep.mubr.bf16.mxu0 %v330_v33 }
 0x144   :  { %1017 = vmatmul.mubr.bf16.gmra.mrb[40].mxu0 %v329_v39 }
 0x145   :  { %1026 = vmatprep.mubr.bf16.mxu0 %v334_v41 }
 0x14c   :  { %1027 = vmatmul.mubr.bf16.gmra.mrb[44].mxu0 %v333_v48 }
 0x14d   :  { %1036 = vmatprep.mubr.bf16.mxu0 %v338_v50 }
 0x154   :  { %1037 = vmatmul.mubr.bf16.gmra.mrb[52].mxu0 %v337_v55  ;;  %v2511_v55 = vld [vmem:[#allocation9 + $0x20] sm:$0xff]  }
 0x1bf   :  { %v2750_v59 = vpop.f32.mrb[48].mxu0 }
 0x1c0   :  { %v2752_v60 = vpop.f32.mrb[49].mxu0 }
 0x1c1   :  { %v881_v62 = vpop.f32.mrb[50].mxu0 }
 0x1c2   :  { %v882_v1 = vpop.f32.mrb[51].mxu0  ;;  %v2512_v62 = vld [vmem:[#allocation9 + $0x68] sm:$0xff]  }
 0x1c7   :  { %v918_v4 = vpop.f32.mrb[0].mxu0 }
 0x1c8   :  { %v1210_v5 = vadd.f32 %v2761_v2, %v918_v4  ;;  %v920_v6 = vpop.f32.mrb[1].mxu0 }
 0x1c9   :  { %v1211_v7 = vadd.f32 %v2765_v3, %v920_v6  ;;  %v922_v8 = vpop.f32.mrb[2].mxu0 }
 0x1ca   :  { %v1212_v9 = vadd.f32 %v2761_v2, %v922_v8  ;;  %v924_v10 = vpop.f32.mrb[3].mxu0  ;;  %v1260_v12 = vmax.f32 %v1210_v5, 0.0 }
 0x1cb   :  { %v1213_v11 = vadd.f32 %v2765_v3, %v924_v10  ;;  %v1261_v14 = vmax.f32 %v1211_v7, 0.0  ;;  %v2513_v7 = vld [vmem:[#allocation9 + $0x28] sm:$0xff]   ;;  %v2514_v10 = vld [vmem:[#allocation9 + $0x70] sm:$0xff]  }
 0x1cc   :  { %v1262_v13 = vmax.f32 %v1212_v9, 0.0 }
 0x1cd   :  { %v1263_v15 = vmax.f32 %v1213_v11, 0.0 }
 0x1ce   :  { %v1310_v16 = vpack.c.bf16 %v1262_v13, %v1260_v12 }
 0x1cf   :  { %v928_v17 = vpop.f32.mrb[4].mxu0  ;;  %v1311_v18 = vpack.c.bf16 %v1263_v15, %v1261_v14 }
 0x1d0   :  { %v1214_v20 = vadd.f32 %v2761_v2, %v928_v17  ;;  %v930_v21 = vpop.f32.mrb[5].mxu0 }
 0x1d1   :  { %v1215_v23 = vadd.f32 %v2765_v3, %v930_v21  ;;  %v932_v24 = vpop.f32.mrb[6].mxu0  ;;  %1572 = vmatprep.mubr.bf16.mxu1 %v1311_v18 }
 0x1d2   :  { %v1216_v25 = vadd.f32 %v2761_v2, %v932_v24  ;;  %v934_v26 = vpop.f32.mrb[7].mxu0  ;;  %1573 = vmatmul.mubr.bf16.vlgmr.msra.gmra.mrb[0].mxu1 %v1310_v16  ;;  %v1264_v29 = vmax.f32 %v1214_v20, 0.0  ;;  %v2515_v16 = vld [vmem:[#allocation9 + $0x30] sm:$0xff]  }
 0x1d3   :  { %v1217_v27 = vadd.f32 %v2765_v3, %v934_v26  ;;  %2206 = vmatpush3.bf16.msra.mxu1 %v2503_v19  ;;  %v1265_v32 = vmax.f32 %v1215_v23, 0.0  ;;  %v2516_v19 = vld [vmem:[#allocation9 + $0x78] sm:$0xff]  }
 0x1d4   :  { %v1266_v30 = vmax.f32 %v1216_v25, 0.0  ;;  %2207 = vmatprep.subr.bf16.mxu1 %v2504_v22  ;;  %v2517_v25 = vld [vmem:[#allocation9 + $0x38] sm:$0xff]  }
 0x1d5   :  { %v1267_v33 = vmax.f32 %v1217_v27, 0.0 }
 0x1d6   :  { %v1312_v34 = vpack.c.bf16 %v1266_v30, %v1264_v29 }
 0x1d7   :  { %v1313_v35 = vpack.c.bf16 %v1267_v33, %v1265_v32  ;;  %v938_v36 = vpop.f32.mrb[8].mxu0  ;;  %2208 = vmatpush3.bf16.msra.mxu1 %v2505_v28 }
 0x1d8   :  { %v1218_v38 = vadd.f32 %v2761_v2, %v938_v36  ;;  %v940_v39 = vpop.f32.mrb[9].mxu0  ;;  %2209 = vmatprep.subr.bf16.mxu1 %v2506_v31 }
 0x1d9   :  { %v1219_v41 = vadd.f32 %v2765_v3, %v940_v39  ;;  %v942_v42 = vpop.f32.mrb[10].mxu0  ;;  %1582 = vmatprep.mubr.bf16.mxu1 %v1313_v35 }
 0x1da   :  { %v1220_v43 = vadd.f32 %v2761_v2, %v942_v42  ;;  %v944_v44 = vpop.f32.mrb[11].mxu0  ;;  %1583 = vmatmul.mubr.bf16.gmra.mrb[4].mxu1 %v1312_v34  ;;  %v1268_v47 = vmax.f32 %v1218_v38, 0.0 }
 0x1db   :  { %v1221_v45 = vadd.f32 %v2765_v3, %v944_v44  ;;  %2210 = vmatpush3.bf16.msra.mxu1 %v2507_v37  ;;  %v1269_v50 = vmax.f32 %v1219_v41, 0.0 }
 0x1dc   :  { %v1270_v48 = vmax.f32 %v1220_v43, 0.0  ;;  %2211 = vmatprep.subr.bf16.mxu1 %v2508_v40 }
 0x1dd   :  { %v1271_v51 = vmax.f32 %v1221_v45, 0.0 }
 0x1de   :  { %v1314_v52 = vpack.c.bf16 %v1270_v48, %v1268_v47 }
 0x1df   :  { %v1315_v53 = vpack.c.bf16 %v1271_v51, %v1269_v50  ;;  %v948_v54 = vpop.f32.mrb[12].mxu0  ;;  %2212 = vmatpush3.bf16.msra.mxu1 %v2509_v46 }
 0x1e0   :  { %v1222_v56 = vadd.f32 %v2761_v2, %v948_v54  ;;  %v950_v57 = vpop.f32.mrb[13].mxu0  ;;  %2213 = vmatprep.subr.bf16.mxu1 %v2510_v49 }
 0x1e1   :  { %v1223_v63 = vadd.f32 %v2765_v3, %v950_v57  ;;  %v952_v1 = vpop.f32.mrb[14].mxu0  ;;  %1592 = vmatprep.mubr.bf16.mxu1 %v1315_v53 }
 0x1e2   :  { %v1224_v4 = vadd.f32 %v2761_v2, %v952_v1  ;;  %v954_v5 = vpop.f32.mrb[15].mxu0  ;;  %1593 = vmatmul.mubr.bf16.gmra.mrb[8].mxu1 %v1314_v52  ;;  %v1272_v8 = vmax.f32 %v1222_v56, 0.0 }
 0x1e3   :  { %v1225_v6 = vadd.f32 %v2765_v3, %v954_v5  ;;  %2214 = vmatpush3.bf16.msra.mxu1 %v2511_v55  ;;  %v1273_v11 = vmax.f32 %v1223_v63, 0.0 }
 0x1e4   :  { %v1274_v9 = vmax.f32 %v1224_v4, 0.0  ;;  %2215 = vmatprep.subr.bf16.mxu1 %v2512_v62 }
 0x1e5   :  { %v1275_v12 = vmax.f32 %v1225_v6, 0.0 }
 0x1e6   :  { %v1316_v13 = vpack.c.bf16 %v1274_v9, %v1272_v8 }
 0x1e7   :  { %v1317_v14 = vpack.c.bf16 %v1275_v12, %v1273_v11  ;;  %v958_v15 = vpop.f32.mrb[16].mxu0  ;;  %2216 = vmatpush3.bf16.msra.mxu1 %v2513_v7 }
 0x1e8   :  { %v1226_v17 = vadd.f32 %v2761_v2, %v958_v15  ;;  %v960_v18 = vpop.f32.mrb[17].mxu0  ;;  %2217 = vmatprep.subr.bf16.mxu1 %v2514_v10 }
 0x1e9   :  { %v1227_v20 = vadd.f32 %v2765_v3, %v960_v18  ;;  %v962_v21 = vpop.f32.mrb[18].mxu0  ;;  %1602 = vmatprep.mubr.bf16.mxu1 %v1317_v14 }
 0x1ea   :  { %v1228_v22 = vadd.f32 %v2761_v2, %v962_v21  ;;  %v964_v23 = vpop.f32.mrb[19].mxu0  ;;  %1603 = vmatmul.mubr.bf16.gmra.mrb[12].mxu1 %v1316_v13  ;;  %v1276_v26 = vmax.f32 %v1226_v17, 0.0 }
 0x1eb   :  { %v1229_v24 = vadd.f32 %v2765_v3, %v964_v23  ;;  %2218 = vmatpush3.bf16.msra.mxu1 %v2515_v16  ;;  %v1277_v28 = vmax.f32 %v1227_v20, 0.0 }
 0x1ec   :  { %v1278_v27 = vmax.f32 %v1228_v22, 0.0  ;;  %2219 = vmatprep.subr.bf16.mxu1 %v2516_v19 }
 0x1ed   :  { %v1279_v29 = vmax.f32 %v1229_v24, 0.0 }
 0x1ee   :  { %v1318_v30 = vpack.c.bf16 %v1278_v27, %v1276_v26 }
 0x1ef   :  { %v1319_v31 = vpack.c.bf16 %v1279_v29, %v1277_v28  ;;  %v968_v32 = vpop.f32.mrb[20].mxu0  ;;  %2220 = vmatpush3.bf16.msra.mxu1 %v2517_v25 }
 0x1f0   :  { %v1230_v33 = vadd.f32 %v2761_v2, %v968_v32  ;;  %v970_v34 = vpop.f32.mrb[21].mxu0 }
 0x1f1   :  { %v1231_v35 = vadd.f32 %v2765_v3, %v970_v34  ;;  %v972_v36 = vpop.f32.mrb[22].mxu0  ;;  %1612 = vmatprep.mubr.bf16.mxu1 %v1319_v31 }
 0x1f2   :  { %v1232_v37 = vadd.f32 %v2761_v2, %v972_v36  ;;  %v974_v38 = vpop.f32.mrb[23].mxu0  ;;  %1613 = vmatmul.mubr.bf16.gmra.mrb[16].mxu1 %v1318_v30  ;;  %v1280_v40 = vmax.f32 %v1230_v33, 0.0 }
 0x1f3   :  { %v1233_v39 = vadd.f32 %v2765_v3, %v974_v38  ;;  %v1281_v42 = vmax.f32 %v1231_v35, 0.0 }
 0x1f4   :  { %v1282_v41 = vmax.f32 %v1232_v37, 0.0 }
 0x1f5   :  { %v1283_v43 = vmax.f32 %v1233_v39, 0.0 }
 0x1f6   :  { %v1320_v44 = vpack.c.bf16 %v1282_v41, %v1280_v40 }
 0x1f7   :  { %v1321_v45 = vpack.c.bf16 %v1283_v43, %v1281_v42  ;;  %v978_v46 = vpop.f32.mrb[24].mxu0 }
 0x1f8   :  { %v1234_v47 = vadd.f32 %v2761_v2, %v978_v46  ;;  %v980_v48 = vpop.f32.mrb[25].mxu0 }
 0x1f9   :  { %v1235_v49 = vadd.f32 %v2765_v3, %v980_v48  ;;  %v982_v50 = vpop.f32.mrb[26].mxu0  ;;  %1622 = vmatprep.mubr.bf16.mxu1 %v1321_v45 }
 0x1fa   :  { %v1236_v51 = vadd.f32 %v2761_v2, %v982_v50  ;;  %v984_v52 = vpop.f32.mrb[27].mxu0  ;;  %1623 = vmatmul.mubr.bf16.gmra.mrb[20].mxu1 %v1320_v44  ;;  %v1284_v54 = vmax.f32 %v1234_v47, 0.0 }
 0x1fb   :  { %v1237_v53 = vadd.f32 %v2765_v3, %v984_v52  ;;  %v1285_v56 = vmax.f32 %v1235_v49, 0.0 }
 0x1fc   :  { %v1286_v55 = vmax.f32 %v1236_v51, 0.0 }
 0x1fd   :  { %v1287_v57 = vmax.f32 %v1237_v53, 0.0 }
 0x1fe   :  { %v1322_v62 = vpack.c.bf16 %v1286_v55, %v1284_v54 }
 0x1ff   :  { %v1323_v63 = vpack.c.bf16 %v1287_v57, %v1285_v56  ;;  %v988_v1 = vpop.f32.mrb[28].mxu0 }
 0x200   :  { %v1238_v4 = vadd.f32 %v2761_v2, %v988_v1  ;;  %v990_v5 = vpop.f32.mrb[29].mxu0 }
 0x201   :  { %v1239_v6 = vadd.f32 %v2765_v3, %v990_v5  ;;  %v992_v7 = vpop.f32.mrb[30].mxu0  ;;  %1632 = vmatprep.mubr.bf16.mxu1 %v1323_v63 }
 0x202   :  { %v1240_v8 = vadd.f32 %v2761_v2, %v992_v7  ;;  %v994_v9 = vpop.f32.mrb[31].mxu0  ;;  %1633 = vmatmul.mubr.bf16.gmra.mrb[24].mxu1 %v1322_v62  ;;  %v1288_v11 = vmax.f32 %v1238_v4, 0.0 }
 0x203   :  { %v1241_v10 = vadd.f32 %v2765_v3, %v994_v9  ;;  %v1289_v13 = vmax.f32 %v1239_v6, 0.0 }
 0x204   :  { %v1290_v12 = vmax.f32 %v1240_v8, 0.0 }
 0x205   :  { %v1291_v14 = vmax.f32 %v1241_v10, 0.0 }
 0x206   :  { %v1324_v15 = vpack.c.bf16 %v1290_v12, %v1288_v11 }
 0x207   :  { %v1325_v16 = vpack.c.bf16 %v1291_v14, %v1289_v13  ;;  %v998_v17 = vpop.f32.mrb[32].mxu0 }
 0x208   :  { %v1242_v18 = vadd.f32 %v2761_v2, %v998_v17  ;;  %v1000_v19 = vpop.f32.mrb[33].mxu0 }
 0x209   :  { %v1243_v20 = vadd.f32 %v2765_v3, %v1000_v19  ;;  %v1002_v21 = vpop.f32.mrb[34].mxu0  ;;  %1642 = vmatprep.mubr.bf16.mxu1 %v1325_v16 }
 0x20a   :  { %v1244_v22 = vadd.f32 %v2761_v2, %v1002_v21  ;;  %v1004_v23 = vpop.f32.mrb[35].mxu0  ;;  %1643 = vmatmul.mubr.bf16.gmra.mrb[28].mxu1 %v1324_v15  ;;  %v1292_v25 = vmax.f32 %v1242_v18, 0.0 }
 0x20b   :  { %v1245_v24 = vadd.f32 %v2765_v3, %v1004_v23  ;;  %v1293_v27 = vmax.f32 %v1243_v20, 0.0 }
 0x20c   :  { %v1294_v26 = vmax.f32 %v1244_v22, 0.0 }
 0x20d   :  { %v1295_v28 = vmax.f32 %v1245_v24, 0.0 }
 0x20e   :  { %v1326_v29 = vpack.c.bf16 %v1294_v26, %v1292_v25 }
 0x20f   :  { %v1327_v30 = vpack.c.bf16 %v1295_v28, %v1293_v27  ;;  %v1008_v31 = vpop.f32.mrb[36].mxu0 }
 0x210   :  { %v1246_v32 = vadd.f32 %v2761_v2, %v1008_v31  ;;  %v1010_v33 = vpop.f32.mrb[37].mxu0 }
 0x211   :  { %v1247_v34 = vadd.f32 %v2765_v3, %v1010_v33  ;;  %v1012_v35 = vpop.f32.mrb[38].mxu0  ;;  %1652 = vmatprep.mubr.bf16.mxu1 %v1327_v30 }
 0x212   :  { %v1248_v36 = vadd.f32 %v2761_v2, %v1012_v35  ;;  %v1014_v37 = vpop.f32.mrb[39].mxu0  ;;  %1653 = vmatmul.mubr.bf16.gmra.mrb[32].mxu1 %v1326_v29  ;;  %v1296_v39 = vmax.f32 %v1246_v32, 0.0 }
 0x213   :  { %v1249_v38 = vadd.f32 %v2765_v3, %v1014_v37  ;;  %v1297_v41 = vmax.f32 %v1247_v34, 0.0 }
 0x214   :  { %v1298_v40 = vmax.f32 %v1248_v36, 0.0 }
 0x215   :  { %v1299_v42 = vmax.f32 %v1249_v38, 0.0 }
 0x216   :  { %v1328_v43 = vpack.c.bf16 %v1298_v40, %v1296_v39 }
 0x217   :  { %v1329_v44 = vpack.c.bf16 %v1299_v42, %v1297_v41  ;;  %v1018_v45 = vpop.f32.mrb[40].mxu0 }
 0x218   :  { %v1250_v46 = vadd.f32 %v2761_v2, %v1018_v45  ;;  %v1020_v47 = vpop.f32.mrb[41].mxu0 }
 0x219   :  { %v1251_v48 = vadd.f32 %v2765_v3, %v1020_v47  ;;  %v1022_v49 = vpop.f32.mrb[42].mxu0  ;;  %1662 = vmatprep.mubr.bf16.mxu1 %v1329_v44 }
 0x21a   :  { %v1252_v50 = vadd.f32 %v2761_v2, %v1022_v49  ;;  %v1024_v51 = vpop.f32.mrb[43].mxu0  ;;  %1663 = vmatmul.mubr.bf16.gmra.mrb[36].mxu1 %v1328_v43  ;;  %v1300_v53 = vmax.f32 %v1250_v46, 0.0 }
 0x21b   :  { %v1253_v52 = vadd.f32 %v2765_v3, %v1024_v51  ;;  %v1301_v55 = vmax.f32 %v1251_v48, 0.0 }
 0x21c   :  { %v1302_v54 = vmax.f32 %v1252_v50, 0.0 }
 0x21d   :  { %v1303_v56 = vmax.f32 %v1253_v52, 0.0 }
 0x21e   :  { %v1330_v57 = vpack.c.bf16 %v1302_v54, %v1300_v53 }
 0x21f   :  { %v1331_v62 = vpack.c.bf16 %v1303_v56, %v1301_v55  ;;  %v1028_v63 = vpop.f32.mrb[44].mxu0 }
 0x220   :  { %v1254_v1 = vadd.f32 %v2761_v2, %v1028_v63  ;;  %v1030_v4 = vpop.f32.mrb[45].mxu0 }
 0x221   :  { %v1255_v5 = vadd.f32 %v2765_v3, %v1030_v4  ;;  %v1032_v6 = vpop.f32.mrb[46].mxu0  ;;  %1672 = vmatprep.mubr.bf16.mxu1 %v1331_v62 }
 0x222   :  { %v1256_v7 = vadd.f32 %v2761_v2, %v1032_v6  ;;  %v1034_v8 = vpop.f32.mrb[47].mxu0  ;;  %1673 = vmatmul.mubr.bf16.gmra.mrb[40].mxu1 %v1330_v57  ;;  %v1304_v10 = vmax.f32 %v1254_v1, 0.0 }
 0x223   :  { %v1257_v9 = vadd.f32 %v2765_v3, %v1034_v8  ;;  %v1305_v12 = vmax.f32 %v1255_v5, 0.0 }
 0x224   :  { %v1306_v11 = vmax.f32 %v1256_v7, 0.0 }
 0x225   :  { %v1307_v13 = vmax.f32 %v1257_v9, 0.0 }
 0x226   :  { %v1332_v14 = vpack.c.bf16 %v1306_v11, %v1304_v10 }
 0x227   :  { %v1333_v15 = vpack.c.bf16 %v1307_v13, %v1305_v12  ;;  %v1038_v16 = vpop.f32.mrb[52].mxu0 }
 0x228   :  { %v1039_v17 = vadd.f32 %v1038_v16, %v2750_v59  ;;  %v1040_v18 = vpop.f32.mrb[53].mxu0  ;;  %v1368_v59 = vld [vmem:[%s2929_s4] sm:$0x3] }
 0x229   :  { %v1041_v19 = vadd.f32 %v1040_v18, %v2752_v60  ;;  %v1042_v20 = vpop.f32.mrb[54].mxu0  ;;  %1682 = vmatprep.mubr.bf16.mxu1 %v1333_v15  ;;  %v2824_v60 = vrot.slane %v1368_v59, %v1202_v61 }
 0x22a   :  { %v1258_v21 = vadd.f32 %v2761_v2, %v1039_v17  ;;  %v1043_v22 = vpop.f32.mrb[55].mxu0  ;;  %1683 = vmatmul.mubr.bf16.gmra.mrb[44].mxu1 %v1332_v14  ;;  %v2828_v2 = vrot.slane %v1368_v59, %v1206_v0 }
 0x22b   :  { %v1259_v23 = vadd.f32 %v2765_v3, %v1041_v19 }
 0x22c   :  { %v1308_v24 = vmax.f32 %v1258_v21, 0.0 }
 0x22d   :  { %v1309_v25 = vmax.f32 %v1259_v23, 0.0 }
 0x22e   :  { %v1334_v27 = vpack.c.bf16 %v1308_v24, %v1308_v24 }
 0x22f   :  { %v1335_v26 = vpack.c.bf16 %v1309_v25, %v1309_v25 }
 0x231   :  { %1692 = vmatprep.mubr.bf16.mxu1 %v1335_v26 }
 0x232   :  { %1693 = vmatmul.mubr.bf16.gmra.mrb[48].mxu1 %v1334_v27 }
 0x2a5   :  { %v1574_v28 = vpop.f32.mrb[0].mxu1 }
 0x2a6   :  { %v1575_v3 = vadd.f32 %v1574_v28, %v2824_v60  ;;  %v1576_v29 = vpop.f32.mrb[1].mxu1 }
 0x2a7   :  { %v1577_v30 = vadd.f32 %v1576_v29, %v2828_v2  ;;  %v1578_v31 = vpop.f32.mrb[2].mxu1 }
 0x2a8   :  { %v1579_v32 = vadd.f32 %v1578_v31, %v2824_v60  ;;  %v1580_v33 = vpop.f32.mrb[3].mxu1  ;;  %v1701_v35 = vmax.f32 %v1575_v3, 0.0 }
 0x2a9   :  { %v1581_v34 = vadd.f32 %v1580_v33, %v2828_v2  ;;  %v1702_v61 = vmax.f32 %v1577_v30, 0.0 }
 0x2aa   :  { %v1703_v36 = vmax.f32 %v1579_v32, 0.0 }
 0x2ab   :  { %v1704_v37 = vmax.f32 %v1581_v34, 0.0 }
 0x2ac   :  { %v1751_v38 = vpack.c.bf16 %v1703_v36, %v1701_v35 }
 0x2ad   :  { %v1752_v58 = vpack.c.bf16 %v1704_v37, %v1702_v61  ;;  %v1584_v0 = vpop.f32.mrb[4].mxu1 }
 0x2ae   :  { %v1585_v39 = vadd.f32 %v1584_v0, %v2824_v60  ;;  %v1586_v40 = vpop.f32.mrb[5].mxu1 }
 0x2af   :  { %v1587_v41 = vadd.f32 %v1586_v40, %v2828_v2  ;;  %v1588_v42 = vpop.f32.mrb[6].mxu1  ;;  %1944 = vmatprep.mubr.bf16.mxu1 %v1752_v58 }
 0x2b0   :  { %v1589_v43 = vadd.f32 %v1588_v42, %v2824_v60  ;;  %v1590_v44 = vpop.f32.mrb[7].mxu1  ;;  %1945 = vmatmul.mubr.bf16.vlgmr.msra.gmra.mrb[52].mxu1 %v1751_v38  ;;  %v1705_v46 = vmax.f32 %v1585_v39, 0.0 }
 0x2b1   :  { %v1591_v45 = vadd.f32 %v1590_v44, %v2828_v2  ;;  %v1706_v48 = vmax.f32 %v1587_v41, 0.0 }
 0x2b2   :  { %v1707_v47 = vmax.f32 %v1589_v43, 0.0 }
 0x2b3   :  { %v1708_v49 = vmax.f32 %v1591_v45, 0.0 }
 0x2b4   :  { %v1753_v50 = vpack.c.bf16 %v1707_v47, %v1705_v46 }
 0x2b5   :  { %v1754_v51 = vpack.c.bf16 %v1708_v49, %v1706_v48  ;;  %v1594_v52 = vpop.f32.mrb[8].mxu1 }
 0x2b6   :  { %v1595_v53 = vadd.f32 %v1594_v52, %v2824_v60  ;;  %v1596_v54 = vpop.f32.mrb[9].mxu1 }
 0x2b7   :  { %v1597_v55 = vadd.f32 %v1596_v54, %v2828_v2  ;;  %v1598_v56 = vpop.f32.mrb[10].mxu1  ;;  %1952 = vmatprep.mubr.bf16.mxu1 %v1754_v51 }
 0x2b8   :  { %v1599_v57 = vadd.f32 %v1598_v56, %v2824_v60  ;;  %v1600_v62 = vpop.f32.mrb[11].mxu1  ;;  %1953 = vmatmul.mubr.bf16.gmra.mrb[56].mxu1 %v1753_v50  ;;  %v1709_v1 = vmax.f32 %v1595_v53, 0.0 }
 0x2b9   :  { %v1601_v63 = vadd.f32 %v1600_v62, %v2828_v2  ;;  %v1710_v5 = vmax.f32 %v1597_v55, 0.0 }
 0x2ba   :  { %v1711_v4 = vmax.f32 %v1599_v57, 0.0 }
 0x2bb   :  { %v1712_v6 = vmax.f32 %v1601_v63, 0.0 }
 0x2bc   :  { %v1755_v7 = vpack.c.bf16 %v1711_v4, %v1709_v1 }
 0x2bd   :  { %v1756_v8 = vpack.c.bf16 %v1712_v6, %v1710_v5  ;;  %v1604_v9 = vpop.f32.mrb[12].mxu1 }
 0x2be   :  { %v1605_v10 = vadd.f32 %v1604_v9, %v2824_v60  ;;  %v1606_v11 = vpop.f32.mrb[13].mxu1 }
 0x2bf   :  { %v1607_v12 = vadd.f32 %v1606_v11, %v2828_v2  ;;  %v1608_v13 = vpop.f32.mrb[14].mxu1  ;;  %1960 = vmatprep.mubr.bf16.mxu1 %v1756_v8 }
 0x2c0   :  { %v1609_v14 = vadd.f32 %v1608_v13, %v2824_v60  ;;  %v1610_v15 = vpop.f32.mrb[15].mxu1  ;;  %1961 = vmatmul.mubr.bf16.gmra.mrb[60].mxu1 %v1755_v7  ;;  %v1713_v17 = vmax.f32 %v1605_v10, 0.0 }
 0x2c1   :  { %v1611_v16 = vadd.f32 %v1610_v15, %v2828_v2  ;;  %v1714_v19 = vmax.f32 %v1607_v12, 0.0 }
 0x2c2   :  { %v1715_v18 = vmax.f32 %v1609_v14, 0.0 }
 0x2c3   :  { %v1716_v20 = vmax.f32 %v1611_v16, 0.0 }
 0x2c4   :  { %v1757_v21 = vpack.c.bf16 %v1715_v18, %v1713_v17 }
 0x2c5   :  { %v1758_v22 = vpack.c.bf16 %v1716_v20, %v1714_v19  ;;  %v1614_v23 = vpop.f32.mrb[16].mxu1 }
 0x2c6   :  { %v1615_v24 = vadd.f32 %v1614_v23, %v2824_v60  ;;  %v1616_v25 = vpop.f32.mrb[17].mxu1 }
 0x2c7   :  { %v1617_v26 = vadd.f32 %v1616_v25, %v2828_v2  ;;  %v1618_v27 = vpop.f32.mrb[18].mxu1  ;;  %1968 = vmatprep.mubr.bf16.mxu1 %v1758_v22 }
 0x2c8   :  { %v1619_v59 = vadd.f32 %v1618_v27, %v2824_v60  ;;  %v1620_v28 = vpop.f32.mrb[19].mxu1  ;;  %1969 = vmatmul.mubr.bf16.gmra.mrb[64].mxu1 %v1757_v21  ;;  %v1717_v29 = vmax.f32 %v1615_v24, 0.0 }
 0x2c9   :  { %v1621_v3 = vadd.f32 %v1620_v28, %v2828_v2  ;;  %v1718_v31 = vmax.f32 %v1617_v26, 0.0 }
 0x2ca   :  { %v1719_v30 = vmax.f32 %v1619_v59, 0.0 }
 0x2cb   :  { %v1720_v32 = vmax.f32 %v1621_v3, 0.0 }
 0x2cc   :  { %v1759_v33 = vpack.c.bf16 %v1719_v30, %v1717_v29 }
 0x2cd   :  { %v1760_v34 = vpack.c.bf16 %v1720_v32, %v1718_v31  ;;  %v1624_v35 = vpop.f32.mrb[20].mxu1 }
 0x2ce   :  { %v1625_v36 = vadd.f32 %v1624_v35, %v2824_v60  ;;  %v1626_v61 = vpop.f32.mrb[21].mxu1 }
 0x2cf   :  { %v1627_v37 = vadd.f32 %v1626_v61, %v2828_v2  ;;  %v1628_v38 = vpop.f32.mrb[22].mxu1  ;;  %1976 = vmatprep.mubr.bf16.mxu1 %v1760_v34 }
 0x2d0   :  { %v1629_v58 = vadd.f32 %v1628_v38, %v2824_v60  ;;  %v1630_v0 = vpop.f32.mrb[23].mxu1  ;;  %1977 = vmatmul.mubr.bf16.gmra.mrb[68].mxu1 %v1759_v33  ;;  %v1721_v40 = vmax.f32 %v1625_v36, 0.0 }
 0x2d1   :  { %v1631_v39 = vadd.f32 %v1630_v0, %v2828_v2  ;;  %v1722_v42 = vmax.f32 %v1627_v37, 0.0 }
 0x2d2   :  { %v1723_v41 = vmax.f32 %v1629_v58, 0.0 }
 0x2d3   :  { %v1724_v43 = vmax.f32 %v1631_v39, 0.0 }
 0x2d4   :  { %v1761_v44 = vpack.c.bf16 %v1723_v41, %v1721_v40 }
 0x2d5   :  { %v1762_v45 = vpack.c.bf16 %v1724_v43, %v1722_v42  ;;  %v1634_v46 = vpop.f32.mrb[24].mxu1 }
 0x2d6   :  { %v1635_v47 = vadd.f32 %v1634_v46, %v2824_v60  ;;  %v1636_v48 = vpop.f32.mrb[25].mxu1 }
 0x2d7   :  { %v1637_v49 = vadd.f32 %v1636_v48, %v2828_v2  ;;  %v1638_v50 = vpop.f32.mrb[26].mxu1  ;;  %1984 = vmatprep.mubr.bf16.mxu1 %v1762_v45 }
 0x2d8   :  { %v1639_v51 = vadd.f32 %v1638_v50, %v2824_v60  ;;  %v1640_v52 = vpop.f32.mrb[27].mxu1  ;;  %1985 = vmatmul.mubr.bf16.gmra.mrb[72].mxu1 %v1761_v44  ;;  %v1725_v54 = vmax.f32 %v1635_v47, 0.0 }
 0x2d9   :  { %v1641_v53 = vadd.f32 %v1640_v52, %v2828_v2  ;;  %v1726_v56 = vmax.f32 %v1637_v49, 0.0 }
 0x2da   :  { %v1727_v55 = vmax.f32 %v1639_v51, 0.0 }
 0x2db   :  { %v1728_v57 = vmax.f32 %v1641_v53, 0.0 }
 0x2dc   :  { %v1763_v62 = vpack.c.bf16 %v1727_v55, %v1725_v54 }
 0x2dd   :  { %v1764_v63 = vpack.c.bf16 %v1728_v57, %v1726_v56  ;;  %v1644_v1 = vpop.f32.mrb[28].mxu1 }
 0x2de   :  { %v1645_v4 = vadd.f32 %v1644_v1, %v2824_v60  ;;  %v1646_v5 = vpop.f32.mrb[29].mxu1 }
 0x2df   :  { %v1647_v6 = vadd.f32 %v1646_v5, %v2828_v2  ;;  %v1648_v7 = vpop.f32.mrb[30].mxu1  ;;  %1992 = vmatprep.mubr.bf16.mxu1 %v1764_v63 }
 0x2e0   :  { %v1649_v8 = vadd.f32 %v1648_v7, %v2824_v60  ;;  %v1650_v9 = vpop.f32.mrb[31].mxu1  ;;  %1993 = vmatmul.mubr.bf16.gmra.mrb[76].mxu1 %v1763_v62  ;;  %v1729_v11 = vmax.f32 %v1645_v4, 0.0 }
 0x2e1   :  { %v1651_v10 = vadd.f32 %v1650_v9, %v2828_v2  ;;  %v1730_v13 = vmax.f32 %v1647_v6, 0.0 }
 0x2e2   :  { %v1731_v12 = vmax.f32 %v1649_v8, 0.0 }
 0x2e3   :  { %v1732_v14 = vmax.f32 %v1651_v10, 0.0 }
 0x2e4   :  { %v1765_v15 = vpack.c.bf16 %v1731_v12, %v1729_v11 }
 0x2e5   :  { %v1766_v16 = vpack.c.bf16 %v1732_v14, %v1730_v13  ;;  %v1654_v17 = vpop.f32.mrb[32].mxu1 }
 0x2e6   :  { %v1655_v18 = vadd.f32 %v1654_v17, %v2824_v60  ;;  %v1656_v19 = vpop.f32.mrb[33].mxu1 }
 0x2e7   :  { %v1657_v20 = vadd.f32 %v1656_v19, %v2828_v2  ;;  %v1658_v21 = vpop.f32.mrb[34].mxu1  ;;  %2000 = vmatprep.mubr.bf16.mxu1 %v1766_v16 }
 0x2e8   :  { %v1659_v22 = vadd.f32 %v1658_v21, %v2824_v60  ;;  %v1660_v23 = vpop.f32.mrb[35].mxu1  ;;  %2001 = vmatmul.mubr.bf16.gmra.mrb[80].mxu1 %v1765_v15  ;;  %v1733_v25 = vmax.f32 %v1655_v18, 0.0 }
 0x2e9   :  { %v1661_v24 = vadd.f32 %v1660_v23, %v2828_v2  ;;  %v1734_v27 = vmax.f32 %v1657_v20, 0.0 }
 0x2ea   :  { %v1735_v26 = vmax.f32 %v1659_v22, 0.0  ;;  %v2883_v22 = vld [vmem:[%s2931_s6] ss:$0 sm:$0xff]  ;;  %s2646_s6 = smov [#allocation11]  }
 0x2eb   :  { %v1736_v59 = vmax.f32 %v1661_v24, 0.0  ;;  %s2078_s10 = sshll.u32 %s2646_s6, 4  ;;  %s2079_s10 = int_to_ptr.vmem [resolvable:$true] %s2078_s10 }
 0x2ec   :  { %v1767_v28 = vpack.c.bf16 %v1735_v26, %v1733_v25  ;;  %s2606_s13 = scalar_lea.vmem %s2079_s10, 3200  ;;  %p2611_p5 = scmp.lt.s32.totalorder %s2079_s10, %s2079_s10 }
 0x2ed   :  { %v1768_v3 = vpack.c.bf16 %v1736_v59, %v1734_v27  ;;  %v1664_v29 = vpop.f32.mrb[36].mxu1  ;;  %p2607_p4 = scmp.ne.s32.totalorder %s2079_s10, %s2606_s13  ;;  %p2612_p6 = scmp.lt.s32.totalorder %s2606_s13, %s2606_s13 }
 0x2ee   :  { %v1665_v30 = vadd.f32 %v1664_v29, %v2824_v60  ;;  %v1666_v31 = vpop.f32.mrb[37].mxu1 }
 0x2ef   :  { %v1667_v32 = vadd.f32 %v1666_v31, %v2828_v2  ;;  %v1668_v33 = vpop.f32.mrb[38].mxu1  ;;  %2008 = vmatprep.mubr.bf16.mxu1 %v1768_v3  ;;  %p2613_p7 = por %p2612_p6, %p2611_p5 }
 0x2f0   :  { %v1669_v34 = vadd.f32 %v1668_v33, %v2824_v60  ;;  %v1670_v35 = vpop.f32.mrb[39].mxu1  ;;  %2009 = vmatmul.mubr.bf16.gmra.mrb[84].mxu1 %v1767_v28  ;;  %v1737_v61 = vmax.f32 %v1665_v30, 0.0 }
 0x2f1   :  { %v1671_v36 = vadd.f32 %v1670_v35, %v2828_v2  ;;  %v1738_v38 = vmax.f32 %v1667_v32, 0.0  ;;  %p2614_p8 = pnand %p2613_p7, %p2607_p4 }
 0x2f2   :  { %v1739_v37 = vmax.f32 %v1669_v34, 0.0 }
 0x2f3   :  { %v1740_v58 = vmax.f32 %v1671_v36, 0.0 }
 0x2f4   :  { %v1769_v0 = vpack.c.bf16 %v1739_v37, %v1737_v61 }
 0x2f5   :  { %v1770_v39 = vpack.c.bf16 %v1740_v58, %v1738_v38  ;;  %v1674_v40 = vpop.f32.mrb[40].mxu1 }
 0x2f6   :  { %v1675_v41 = vadd.f32 %v1674_v40, %v2824_v60  ;;  %v1676_v42 = vpop.f32.mrb[41].mxu1 }
 0x2f7   :  { %v1677_v43 = vadd.f32 %v1676_v42, %v2828_v2  ;;  %v1678_v44 = vpop.f32.mrb[42].mxu1  ;;  %2016 = vmatprep.mubr.bf16.mxu1 %v1770_v39 }
 0x2f8   :  { %v1679_v45 = vadd.f32 %v1678_v44, %v2824_v60  ;;  %v1680_v46 = vpop.f32.mrb[43].mxu1  ;;  %2017 = vmatmul.mubr.bf16.gmra.mrb[88].mxu1 %v1769_v0  ;;  %v1741_v48 = vmax.f32 %v1675_v41, 0.0 }
 0x2f9   :  { %v1681_v47 = vadd.f32 %v1680_v46, %v2828_v2  ;;  %v1742_v50 = vmax.f32 %v1677_v43, 0.0 }
 0x2fa   :  { %v1743_v49 = vmax.f32 %v1679_v45, 0.0 }
 0x2fb   :  { %v1744_v51 = vmax.f32 %v1681_v47, 0.0 }
 0x2fc   :  { %v1771_v52 = vpack.c.bf16 %v1743_v49, %v1741_v48 }
 0x2fd   :  { %v1772_v53 = vpack.c.bf16 %v1744_v51, %v1742_v50  ;;  %v1684_v54 = vpop.f32.mrb[44].mxu1 }
 0x2fe   :  { %v1685_v55 = vadd.f32 %v1684_v54, %v2824_v60  ;;  %v1686_v56 = vpop.f32.mrb[45].mxu1 }
 0x2ff   :  { %v1687_v57 = vadd.f32 %v1686_v56, %v2828_v2  ;;  %v1688_v62 = vpop.f32.mrb[46].mxu1  ;;  %2024 = vmatprep.mubr.bf16.mxu1 %v1772_v53 }
 0x300   :  { %v1689_v63 = vadd.f32 %v1688_v62, %v2824_v60  ;;  %v1690_v1 = vpop.f32.mrb[47].mxu1  ;;  %2025 = vmatmul.mubr.bf16.gmra.mrb[92].mxu1 %v1771_v52  ;;  %v1745_v5 = vmax.f32 %v1685_v55, 0.0 }
 0x301   :  { %v1691_v4 = vadd.f32 %v1690_v1, %v2828_v2  ;;  %v1746_v7 = vmax.f32 %v1687_v57, 0.0 }
 0x302   :  { %v1747_v6 = vmax.f32 %v1689_v63, 0.0 }
 0x303   :  { %v1748_v8 = vmax.f32 %v1691_v4, 0.0 }
 0x304   :  { %v1773_v9 = vpack.c.bf16 %v1747_v6, %v1745_v5 }
 0x305   :  { %v1774_v10 = vpack.c.bf16 %v1748_v8, %v1746_v7  ;;  %v1694_v11 = vpop.f32.mrb[48].mxu1 }
 0x306   :  { %v1695_v12 = vadd.f32 %v1694_v11, %v2824_v60  ;;  %v1696_v13 = vpop.f32.mrb[49].mxu1 }
 0x307   :  { %v1697_v14 = vadd.f32 %v1696_v13, %v2828_v2  ;;  %v1698_v15 = vpop.f32.mrb[50].mxu1  ;;  %2032 = vmatprep.mubr.bf16.mxu1 %v1774_v10 }
 0x308   :  { %v1699_v16 = vpop.f32.mrb[51].mxu1  ;;  %2033 = vmatmul.mubr.bf16.gmra.mrb[96].mxu1 %v1773_v9  ;;  %v1749_v18 = vmax.f32 %v1695_v12, 0.0 }
 0x309   :  { %v1750_v17 = vmax.f32 %v1697_v14, 0.0 }
 0x30a   :  { %v1775_v20 = vpack.c.bf16 %v1749_v18, %v1749_v18 }
 0x30b   :  { %v1776_v19 = vpack.c.bf16 %v1750_v17, %v1750_v17 }
 0x30d   :  { %2040 = vmatprep.mubr.bf16.mxu1 %v1776_v19 }
 0x310   :  { %2041 = vmatmul.mubr.bf16.gmra.mrb[100].mxu1 %v1775_v20 }
 0x383   :  { %v2221_v21 = vpop.f32.mrb[52].mxu1 }
 0x384   :  { %v2222_v60 = vpop.f32.mrb[53].mxu1 }
 0x385   :  { %v2223_v23 = vadd.f32 %v2222_v60, %v2221_v21  ;;  %v2224_v24 = vpop.f32.mrb[54].mxu1 }
 0x386   :  { %v2225_v2 = vpop.f32.mrb[55].mxu1 }
 0x387   :  { %v1947_v25 = vadd.f32 %v2223_v23, %v2883_v22  ;;  %v2226_v26 = vadd.f32 %v2225_v2, %v2224_v24 }
 0x389   :  { %2048 = vst [vmem:[#allocation11] sm:$0xff] %v1947_v25  ;;  %v1950_v27 = vadd.f32 %v2226_v26, %v2883_v22 }
 0x38b   :  { %2049 = vst [vmem:[#allocation11 + $0x8] sm:$0xff] %v1950_v27  ;;  %v2227_v59 = vpop.f32.mrb[56].mxu1 }
 0x38c   :  { %v2228_v28 = vpop.f32.mrb[57].mxu1 }
 0x38d   :  { %v2229_v3 = vadd.f32 %v2228_v28, %v2227_v59  ;;  %v2230_v29 = vpop.f32.mrb[58].mxu1 }
 0x38e   :  { %v2231_v30 = vpop.f32.mrb[59].mxu1 }
 0x38f   :  { %v1955_v31 = vadd.f32 %v2229_v3, %v2883_v22  ;;  %v2232_v32 = vadd.f32 %v2231_v30, %v2230_v29 }
 0x391   :  { %2050 = vst [vmem:[#allocation11 + $0x10] sm:$0xff] %v1955_v31  ;;  %v1958_v33 = vadd.f32 %v2232_v32, %v2883_v22 }
 0x393   :  { %2051 = vst [vmem:[#allocation11 + $0x18] sm:$0xff] %v1958_v33  ;;  %v2233_v34 = vpop.f32.mrb[60].mxu1 }
 0x394   :  { %v2234_v35 = vpop.f32.mrb[61].mxu1 }
 0x395   :  { %v2235_v36 = vadd.f32 %v2234_v35, %v2233_v34  ;;  %v2236_v61 = vpop.f32.mrb[62].mxu1 }
 0x396   :  { %v2237_v37 = vpop.f32.mrb[63].mxu1 }
 0x397   :  { %v1963_v38 = vadd.f32 %v2235_v36, %v2883_v22  ;;  %v2238_v58 = vadd.f32 %v2237_v37, %v2236_v61 }
 0x399   :  { %2052 = vst [vmem:[#allocation11 + $0x20] sm:$0xff] %v1963_v38  ;;  %v1966_v0 = vadd.f32 %v2238_v58, %v2883_v22 }
 0x39b   :  { %2053 = vst [vmem:[#allocation11 + $0x28] sm:$0xff] %v1966_v0  ;;  %v2239_v39 = vpop.f32.mrb[64].mxu1 }
 0x39c   :  { %v2240_v40 = vpop.f32.mrb[65].mxu1 }
 0x39d   :  { %v2241_v41 = vadd.f32 %v2240_v40, %v2239_v39  ;;  %v2242_v42 = vpop.f32.mrb[66].mxu1 }
 0x39e   :  { %v2243_v43 = vpop.f32.mrb[67].mxu1 }
 0x39f   :  { %v1971_v44 = vadd.f32 %v2241_v41, %v2883_v22  ;;  %v2244_v45 = vadd.f32 %v2243_v43, %v2242_v42 }
 0x3a1   :  { %2054 = vst [vmem:[#allocation11 + $0x30] sm:$0xff] %v1971_v44  ;;  %v1974_v46 = vadd.f32 %v2244_v45, %v2883_v22 }
 0x3a3   :  { %2055 = vst [vmem:[#allocation11 + $0x38] sm:$0xff] %v1974_v46  ;;  %v2245_v47 = vpop.f32.mrb[68].mxu1 }
 0x3a4   :  { %v2246_v48 = vpop.f32.mrb[69].mxu1 }
 0x3a5   :  { %v2247_v49 = vadd.f32 %v2246_v48, %v2245_v47  ;;  %v2248_v50 = vpop.f32.mrb[70].mxu1 }
 0x3a6   :  { %v2249_v51 = vpop.f32.mrb[71].mxu1 }
 0x3a7   :  { %v1979_v52 = vadd.f32 %v2247_v49, %v2883_v22  ;;  %v2250_v53 = vadd.f32 %v2249_v51, %v2248_v50 }
 0x3a9   :  { %2056 = vst [vmem:[#allocation11 + $0x40] sm:$0xff] %v1979_v52  ;;  %v1982_v54 = vadd.f32 %v2250_v53, %v2883_v22 }
 0x3ab   :  { %2057 = vst [vmem:[#allocation11 + $0x48] sm:$0xff] %v1982_v54  ;;  %v2251_v55 = vpop.f32.mrb[72].mxu1 }
 0x3ac   :  { %v2252_v56 = vpop.f32.mrb[73].mxu1 }
 0x3ad   :  { %v2253_v57 = vadd.f32 %v2252_v56, %v2251_v55  ;;  %v2254_v62 = vpop.f32.mrb[74].mxu1 }
 0x3ae   :  { %v2255_v63 = vpop.f32.mrb[75].mxu1 }
 0x3af   :  { %v1987_v1 = vadd.f32 %v2253_v57, %v2883_v22  ;;  %v2256_v4 = vadd.f32 %v2255_v63, %v2254_v62 }
 0x3b1   :  { %2058 = vst [vmem:[#allocation11 + $0x50] sm:$0xff] %v1987_v1  ;;  %v1990_v5 = vadd.f32 %v2256_v4, %v2883_v22 }
 0x3b3   :  { %2059 = vst [vmem:[#allocation11 + $0x58] sm:$0xff] %v1990_v5  ;;  %v2257_v6 = vpop.f32.mrb[76].mxu1 }
 0x3b4   :  { %v2258_v7 = vpop.f32.mrb[77].mxu1 }
 0x3b5   :  { %v2259_v8 = vadd.f32 %v2258_v7, %v2257_v6  ;;  %v2260_v9 = vpop.f32.mrb[78].mxu1 }
 0x3b6   :  { %v2261_v10 = vpop.f32.mrb[79].mxu1 }
 0x3b7   :  { %v1995_v11 = vadd.f32 %v2259_v8, %v2883_v22  ;;  %v2262_v12 = vadd.f32 %v2261_v10, %v2260_v9 }
 0x3b9   :  { %2060 = vst [vmem:[#allocation11 + $0x60] sm:$0xff] %v1995_v11  ;;  %v1998_v13 = vadd.f32 %v2262_v12, %v2883_v22 }
 0x3bb   :  { %2061 = vst [vmem:[#allocation11 + $0x68] sm:$0xff] %v1998_v13  ;;  %v2263_v14 = vpop.f32.mrb[80].mxu1 }
 0x3bc   :  { %v2264_v15 = vpop.f32.mrb[81].mxu1 }
 0x3bd   :  { %v2265_v16 = vadd.f32 %v2264_v15, %v2263_v14  ;;  %v2266_v17 = vpop.f32.mrb[82].mxu1 }
 0x3be   :  { %v2267_v18 = vpop.f32.mrb[83].mxu1 }
 0x3bf   :  { %v2003_v19 = vadd.f32 %v2265_v16, %v2883_v22  ;;  %v2268_v20 = vadd.f32 %v2267_v18, %v2266_v17 }
 0x3c1   :  { %2062 = vst [vmem:[#allocation11 + $0x70] sm:$0xff] %v2003_v19  ;;  %v2006_v21 = vadd.f32 %v2268_v20, %v2883_v22 }
 0x3c3   :  { %2063 = vst [vmem:[#allocation11 + $0x78] sm:$0xff] %v2006_v21  ;;  %v2269_v60 = vpop.f32.mrb[84].mxu1 }
 0x3c4   :  { %v2270_v23 = vpop.f32.mrb[85].mxu1 }
 0x3c5   :  { %v2271_v24 = vadd.f32 %v2270_v23, %v2269_v60  ;;  %v2272_v2 = vpop.f32.mrb[86].mxu1 }
 0x3c6   :  { %v2273_v25 = vpop.f32.mrb[87].mxu1 }
 0x3c7   :  { %v2011_v26 = vadd.f32 %v2271_v24, %v2883_v22  ;;  %v2274_v27 = vadd.f32 %v2273_v25, %v2272_v2 }
 0x3c9   :  { %2064 = vst [vmem:[#allocation11 + $0x80] sm:$0xff] %v2011_v26  ;;  %v2014_v59 = vadd.f32 %v2274_v27, %v2883_v22 }
 0x3cb   :  { %2065 = vst [vmem:[#allocation11 + $0x88] sm:$0xff] %v2014_v59  ;;  %v2275_v28 = vpop.f32.mrb[88].mxu1 }
 0x3cc   :  { %v2276_v3 = vpop.f32.mrb[89].mxu1 }
 0x3cd   :  { %v2277_v29 = vadd.f32 %v2276_v3, %v2275_v28  ;;  %v2278_v30 = vpop.f32.mrb[90].mxu1 }
 0x3ce   :  { %v2279_v31 = vpop.f32.mrb[91].mxu1 }
 0x3cf   :  { %v2019_v32 = vadd.f32 %v2277_v29, %v2883_v22  ;;  %v2280_v33 = vadd.f32 %v2279_v31, %v2278_v30 }
 0x3d1   :  { %2066 = vst [vmem:[#allocation11 + $0x90] sm:$0xff] %v2019_v32  ;;  %v2022_v34 = vadd.f32 %v2280_v33, %v2883_v22 }
 0x3d3   :  { %2067 = vst [vmem:[#allocation11 + $0x98] sm:$0xff] %v2022_v34  ;;  %v2281_v35 = vpop.f32.mrb[92].mxu1 }
 0x3d4   :  { %v2282_v36 = vpop.f32.mrb[93].mxu1 }
 0x3d5   :  { %v2283_v61 = vadd.f32 %v2282_v36, %v2281_v35  ;;  %v2284_v37 = vpop.f32.mrb[94].mxu1 }
 0x3d6   :  { %v2285_v38 = vpop.f32.mrb[95].mxu1 }
 0x3d7   :  { %v2027_v58 = vadd.f32 %v2283_v61, %v2883_v22  ;;  %v2286_v0 = vadd.f32 %v2285_v38, %v2284_v37 }
 0x3d9   :  { %2068 = vst [vmem:[#allocation11 + $0xa0] sm:$0xff] %v2027_v58  ;;  %v2030_v39 = vadd.f32 %v2286_v0, %v2883_v22 }
 0x3db   :  { %2069 = vst [vmem:[#allocation11 + $0xa8] sm:$0xff] %v2030_v39  ;;  %v2287_v40 = vpop.f32.mrb[96].mxu1 }
 0x3dc   :  { %v2288_v41 = vpop.f32.mrb[97].mxu1 }
 0x3dd   :  { %v2289_v42 = vadd.f32 %v2288_v41, %v2287_v40  ;;  %v2290_v43 = vpop.f32.mrb[98].mxu1 }
 0x3de   :  { %v2291_v44 = vpop.f32.mrb[99].mxu1 }
 0x3df   :  { %v2035_v45 = vadd.f32 %v2289_v42, %v2883_v22  ;;  %v2292_v46 = vadd.f32 %v2291_v44, %v2290_v43 }
 0x3e1   :  { %2070 = vst [vmem:[#allocation11 + $0xb0] sm:$0xff] %v2035_v45  ;;  %v2038_v47 = vadd.f32 %v2292_v46, %v2883_v22 }
 0x3e3   :  { %2071 = vst [vmem:[#allocation11 + $0xb8] sm:$0xff] %v2038_v47  ;;  %v2293_v48 = vpop.f32.mrb[100].mxu1 }
 0x3e4   :  { %v2294_v49 = vpop.f32.mrb[101].mxu1 }
 0x3e5   :  { %v2295_v50 = vadd.f32 %v2294_v49, %v2293_v48  ;;  %v2296_v51 = vpop.f32.mrb[102].mxu1 }
 0x3e6   :  { %v2297_v52 = vpop.f32.mrb[103].mxu1 }
 0x3e7   :  { %v2043_v53 = vadd.f32 %v2295_v50, %v2883_v22 }
 0x3e9   :  { %2072 = vst [vmem:[#allocation11 + $0xc0] sm:$0xff] %v2043_v53 }
 0x3ea   :  { %2617 = shalt.err (!%p2614_p8)
}
 0x3eb   :  { %s2618_s17 = scalar_lea.hbm %s2932_s7, 3200 }
 0x3ec   :  { %p2619_p9 = scmp.ne.s32.totalorder %s2932_s7, %s2618_s17  ;;  %p2622_p10 = scmp.lt.u32.totalorder %s2618_s17, %s2932_s7 }
 0x3ee   :  { %p2624_p11 = pnand %p2622_p10, %p2619_p9 }
 0x3f0   :  { %2627 = shalt.err (!%p2624_p11)
}
 0x3f1   :  { %2084 = dma.vmem_to_hbm [thread:$0]  %s2079_s10, 3200, %s2932_s7, [#allocation5], %s2637_s11, %s2637_s11, %s2638_s12  }
 0x3f2   :  { %2634 = dma.done.wait [#allocation5], 3200  }
 0x3f3   :  { %2635 = vsyncadd [#allocation5], 4294964096 }
 0x3f4   :  { %2088 = vsyncpa [#allocation4], 1 }
 0x3f5   :  { %2089 = vsyncpa [#allocation7], 1 }
 0x3f6   :  { %2090 = vsyncpa [#allocation10], 1 }
 0x3f7   :  { %2091 = vsyncpa [#allocation5], 1 }

</bundles_post_ra>
